<compile_context>
chip_gen: v6e
topology: v6e:2x2x1
jax: 0.10.0
libtpu: 0.0.40
codegen_flags: <defaults>
</compile_context>

<pallas_src>
import jax
import jax.numpy as jnp
from jax.experimental import pallas as pl
from jax.experimental.pallas import tpu as pltpu


# ---------------------------------------------------------------------------
# Model configuration (stand-in for `settings`)
# ---------------------------------------------------------------------------
MAX_SEQUENCE_LENGTH = 7            # settings.max_sequence_length
EMBEDDING_SIZE = 32                # settings.embedding_size
SEQ_LEN = MAX_SEQUENCE_LENGTH + 1  # module uses max_sequence_length + 1 -> 8
IN_FEATURES = SEQ_LEN * EMBEDDING_SIZE  # 8 * 32 = 256
HID1 = 1500                        # logical fc1 width
HID1_PAD = 1536                    # 12 * 128: lane/MXU aligned padded width
HID1_CHUNK = 512                   # in-kernel chunk of the hidden axis
N_CHUNK = HID1_PAD // HID1_CHUNK   # 3
HID2 = 128
OUT = 1

MAX_BATCH_TILE = 1024              # per-step overhead amortized; ~8 MiB VMEM w/ chunking
VMEM_LIMIT_BYTES = 32 * 1024 * 1024  # explicit & portable across v5e/v6e/v7x


def _cdiv(a, b):
    return -(-a // b)


def _round_up(x, m):
    return (x + m - 1) // m * m


def _choose_batch_tile(B):
    """Pick (tile, n_tiles): tile % 8 == 0, tiles balanced, >=2 tiles when B>=16."""
    min_tiles = 2 if B >= 16 else 1                      # v7x: shard across 2 TCs
    n_tiles = max(min_tiles, _cdiv(B, MAX_BATCH_TILE))   # respect the VMEM-derived cap
    tb = _round_up(_cdiv(B, n_tiles), 8)                 # balanced, sublane-aligned
    n_tiles = max(min_tiles, _cdiv(B, tb))
    return tb, n_tiles


# ---------------------------------------------------------------------------
# Pallas kernel: fused fc1 -> ReLU -> fc2 -> ReLU -> hf0 -> ReLU
# ---------------------------------------------------------------------------
def _high_fidelity_kernel(x_ref, w1_ref, b1_ref, w2_ref, b2_ref, w3_ref, b3_ref,
                          o_ref):
    # (TB, 256) activations, cast to bf16 for the MXU; accumulate in f32.
    x = x_ref[...].astype(jnp.bfloat16)
    tb = x.shape[0]

    # Chunk the 1536-wide hidden layer: never materialize the full (TB, 1536)
    # f32 h1 (it would spill through VMEM).  Static Python loop -> fully
    # unrolled, all slice offsets are lane/sublane-tile aligned constants.
    acc = jnp.zeros((tb, HID2), jnp.float32)
    for c in range(N_CHUNK):
        lo = c * HID1_CHUNK
        hi = lo + HID1_CHUNK
        h1 = jnp.dot(x, w1_ref[:, lo:hi], preferred_element_type=jnp.float32)
        h1 = jnp.maximum(h1 + b1_ref[:, lo:hi], 0.0)            # (TB, 512) ReLU
        # dropout(0.1) -> identity in eval mode
        acc = acc + jnp.dot(h1.astype(jnp.bfloat16), w2_ref[lo:hi, :],
                            preferred_element_type=jnp.float32)

    h2 = jnp.maximum(acc + b2_ref[...], 0.0)                    # (TB, 128) ReLU
    # dropout(0.1) -> identity in eval mode

    # hf0: output width 1 -> VPU multiply + cross-lane (XLU) reduce is cheaper
    # than a near-empty MXU pass.
    p0 = jnp.sum(h2 * w3_ref[...].astype(jnp.float32), axis=-1, keepdims=True)
    p0 = jnp.maximum(p0 + b3_ref[...], 0.0)                     # (TB, 1) ReLU

    o_ref[...] = p0.astype(o_ref.dtype)


def high_fidelity_forward(memory_, params):
    """memory_: (B, SEQ_LEN, EMBEDDING_SIZE) float32 -> (B, 1) float32."""
    B = memory_.shape[0]
    x = memory_.reshape(B, SEQ_LEN * EMBEDDING_SIZE)

    # Balanced batch tiling; >=2 tiles when possible so v7x's 2 TCs both work.
    TB, n_tiles = _choose_batch_tile(B)
    B_pad = TB * n_tiles
    if B_pad != B:
        x = jnp.pad(x, ((0, B_pad - B), (0, 0)))

    w1, b1 = params["w1"], params["b1"]          # (256,1536) bf16, (1,1536) f32
    w2, b2 = params["w2"], params["b2"]          # (1536,128) bf16, (1,128)  f32
    w3, b3 = params["w3"], params["b3"]          # (1,128)    bf16, (1,1)    f32

    grid = (n_tiles,)

    cost = pl.CostEstimate(
        flops=2 * B_pad * (IN_FEATURES * HID1_PAD + HID1_PAD * HID2 + HID2),
        transcendentals=0,
        bytes_accessed=(w1.size + w2.size + w3.size) * 2          # bf16 weights (once)
        + (b1.size + b2.size + b3.size) * 4                       # f32 biases
        + B_pad * (IN_FEATURES * x.dtype.itemsize + OUT * 4),     # activations + out
    )

    out = pl.pallas_call(
        _high_fidelity_kernel,
        out_shape=jax.ShapeDtypeStruct((B_pad, OUT), jnp.float32),
        grid=grid,
        in_specs=[
            pl.BlockSpec((TB, IN_FEATURES), lambda i: (i, 0)),        # x: walks batch
            pl.BlockSpec((IN_FEATURES, HID1_PAD), lambda i: (0, 0)),  # w1: resident
            pl.BlockSpec((1, HID1_PAD), lambda i: (0, 0)),            # b1: resident
            pl.BlockSpec((HID1_PAD, HID2), lambda i: (0, 0)),         # w2: resident
            pl.BlockSpec((1, HID2), lambda i: (0, 0)),                # b2: resident
            pl.BlockSpec((1, HID2), lambda i: (0, 0)),                # w3 row: resident
            pl.BlockSpec((1, 1), lambda i: (0, 0)),                   # b3: resident
        ],
        out_specs=pl.BlockSpec((TB, OUT), lambda i: (i, 0)),
        compiler_params=pltpu.CompilerParams(
            dimension_semantics=("parallel",),
            vmem_limit_bytes=VMEM_LIMIT_BYTES),
        cost_estimate=cost,
    )(x, w1, b1, w2, b2, w3, b3)

    return out[:B]


# ---------------------------------------------------------------------------
# Parameter init (PyTorch nn.Linear style) + packing (pad + bf16 cast)
# ---------------------------------------------------------------------------
def init_master_params(key):
    """Unpadded f32 master params, stored as (in, out) so y = x @ W + b."""
    def linear_init(key, fan_in, fan_out):
        kw, kb = jax.random.split(key)
        bound = 1.0 / jnp.sqrt(fan_in)
        w = jax.random.uniform(kw, (fan_in, fan_out), jnp.float32, -bound, bound)
        b = jax.random.uniform(kb, (1, fan_out), jnp.float32, -bound, bound)
        return w, b

    k1, k2, k3 = jax.random.split(key, 3)
    w1, b1 = linear_init(k1, IN_FEATURES, HID1)
    w2, b2 = linear_init(k2, HID1, HID2)
    w3, b3 = linear_init(k3, HID2, OUT)
    return {"w1": w1, "b1": b1, "w2": w2, "b2": b2, "w3": w3, "b3": b3}


def prepare_params(master):
    """Pad HID1 -> 1536 with zeros and cast weights to bf16 for the kernel."""
    pad = HID1_PAD - HID1
    w1 = jnp.pad(master["w1"], ((0, 0), (0, pad)))            # zero columns
    b1 = jnp.pad(master["b1"], ((0, 0), (0, pad)))            # zero bias -> ReLU(0)=0
    w2 = jnp.pad(master["w2"], ((0, pad), (0, 0)))            # zero rows -> no contribution
    w3 = master["w3"].reshape(1, HID2)                        # (128,1) -> row (1,128)
    return {
        "w1": w1.astype(jnp.bfloat16),
        "b1": b1.astype(jnp.float32),
        "w2": w2.astype(jnp.bfloat16),
        "b2": master["b2"].astype(jnp.float32),
        "w3": w3.astype(jnp.bfloat16),
        "b3": master["b3"].reshape(1, 1).astype(jnp.float32),
    }


# ---------------------------------------------------------------------------
# Reference (plain JAX, same bf16-weight numerics, f32 accumulation)
# ---------------------------------------------------------------------------
def reference_forward(memory_, master):
    x = memory_.reshape(memory_.shape[0], -1)
    w1 = master["w1"].astype(jnp.bfloat16)
    w2 = master["w2"].astype(jnp.bfloat16)
    w3 = master["w3"].astype(jnp.bfloat16).astype(jnp.float32)
    h1 = jnp.maximum(
        jnp.dot(x.astype(jnp.bfloat16), w1, preferred_element_type=jnp.float32)
        + master["b1"], 0.0)
    h2 = jnp.maximum(
        jnp.dot(h1.astype(jnp.bfloat16), w2, preferred_element_type=jnp.float32)
        + master["b2"], 0.0)
    p0 = jnp.maximum(h2 @ w3 + master["b3"], 0.0)
    return p0


if __name__ == "__main__":
    key = jax.random.PRNGKey(0)
    k_params, k_input = jax.random.split(key)

    master = init_master_params(k_params)
    params = prepare_params(master)

    B = 8
    memory_ = jax.random.normal(k_input, (B, SEQ_LEN, EMBEDDING_SIZE), jnp.float32)

    out = high_fidelity_forward(memory_, params)
    out = jax.block_until_ready(out)

    ref = reference_forward(memory_, master)
    assert out.shape == (B, OUT)
    assert jnp.allclose(out, ref, atol=1e-3, rtol=1e-3), \
        f"max abs err = {float(jnp.max(jnp.abs(out - ref)))}"

    print("KERNEL_OK")
</pallas_src>

<mosaic_0001>
module attributes {stable_mosaic.version = 11 : i64} {
  func.func @_high_fidelity_kernel(%arg0: i32, %arg1: memref<8x256xf32, #tpu.memory_space<vmem>>, %arg2: memref<256x1536xbf16, #tpu.memory_space<vmem>>, %arg3: memref<1x1536xf32, #tpu.memory_space<vmem>>, %arg4: memref<1536x128xbf16, #tpu.memory_space<vmem>>, %arg5: memref<1x128xf32, #tpu.memory_space<vmem>>, %arg6: memref<1x128xbf16, #tpu.memory_space<vmem>>, %arg7: memref<1x1xf32, #tpu.memory_space<vmem>>, %arg8: memref<8x1xf32, #tpu.memory_space<vmem>>) attributes {dimension_semantics = [#tpu.dimension_semantics<parallel>], iteration_bounds = array<i64: 1>, scalar_prefetch = 0 : i64, scratch_operands = 0 : i64, tpu.core_type = #tpu.core_type<tc>, window_params = [{transform_indices = @transform_0, window_bounds = array<i64: 8, 256>}, {pipeline_mode = #tpu.pipeline_mode<synchronous>, transform_indices = @transform_1, window_bounds = array<i64: 256, 1536>}, {pipeline_mode = #tpu.pipeline_mode<synchronous>, transform_indices = @transform_2, window_bounds = array<i64: 1, 1536>}, {pipeline_mode = #tpu.pipeline_mode<synchronous>, transform_indices = @transform_3, window_bounds = array<i64: 1536, 128>}, {pipeline_mode = #tpu.pipeline_mode<synchronous>, transform_indices = @transform_4, window_bounds = array<i64: 1, 128>}, {pipeline_mode = #tpu.pipeline_mode<synchronous>, transform_indices = @transform_5, window_bounds = array<i64: 1, 128>}, {pipeline_mode = #tpu.pipeline_mode<synchronous>, transform_indices = @transform_6, window_bounds = array<i64: 1, 1>}, {transform_indices = @transform_7, window_bounds = array<i64: 8, 1>}]} {
    %c0 = arith.constant 0 : index
    %c0_0 = arith.constant 0 : index
    %0 = vector.load %arg1[%c0, %c0_0] : memref<8x256xf32, #tpu.memory_space<vmem>>, vector<8x256xf32>
    %1 = arith.truncf %0 : vector<8x256xf32> to vector<8x256xbf16>
    %cst = arith.constant 0.000000e+00 : f32
    %2 = vector.broadcast %cst : f32 to vector<8x128xf32>
    %c0_1 = arith.constant 0 : index
    %c0_2 = arith.constant 0 : index
    %3 = vector.load %arg2[%c0_1, %c0_2] : memref<256x1536xbf16, #tpu.memory_space<vmem>>, vector<256x512xbf16>
    %cst_3 = arith.constant dense<0.000000e+00> : vector<8x512xf32>
    %4 = tpu.matmul %1, %3, %cst_3 {dimension_numbers = #tpu.dot_dimension_numbers<[1], [0], [0], [1], [0, 0, 1, 1], [], []>} : vector<8x256xbf16>, vector<256x512xbf16>, vector<8x512xf32> -> vector<8x512xf32>
    %c0_4 = arith.constant 0 : index
    %c0_5 = arith.constant 0 : index
    %5 = vector.load %arg3[%c0_4, %c0_5] : memref<1x1536xf32, #tpu.memory_space<vmem>>, vector<1x512xf32>
    %6 = vector.broadcast %5 : vector<1x512xf32> to vector<8x512xf32>
    %7 = arith.addf %4, %6 : vector<8x512xf32>
    %cst_6 = arith.constant 0.000000e+00 : f32
    %8 = vector.broadcast %cst_6 : f32 to vector<8x512xf32>
    %9 = arith.maximumf %7, %8 : vector<8x512xf32>
    %10 = arith.truncf %9 : vector<8x512xf32> to vector<8x512xbf16>
    %c0_7 = arith.constant 0 : index
    %c0_8 = arith.constant 0 : index
    %11 = vector.load %arg4[%c0_7, %c0_8] : memref<1536x128xbf16, #tpu.memory_space<vmem>>, vector<512x128xbf16>
    %cst_9 = arith.constant dense<0.000000e+00> : vector<8x128xf32>
    %12 = tpu.matmul %10, %11, %cst_9 {dimension_numbers = #tpu.dot_dimension_numbers<[1], [0], [0], [1], [0, 0, 1, 1], [], []>} : vector<8x512xbf16>, vector<512x128xbf16>, vector<8x128xf32> -> vector<8x128xf32>
    %13 = arith.addf %2, %12 : vector<8x128xf32>
    %c0_10 = arith.constant 0 : index
    %c512 = arith.constant 512 : index
    %14 = vector.load %arg2[%c0_10, %c512] : memref<256x1536xbf16, #tpu.memory_space<vmem>>, vector<256x512xbf16>
    %cst_11 = arith.constant dense<0.000000e+00> : vector<8x512xf32>
    %15 = tpu.matmul %1, %14, %cst_11 {dimension_numbers = #tpu.dot_dimension_numbers<[1], [0], [0], [1], [0, 0, 1, 1], [], []>} : vector<8x256xbf16>, vector<256x512xbf16>, vector<8x512xf32> -> vector<8x512xf32>
    %c0_12 = arith.constant 0 : index
    %c512_13 = arith.constant 512 : index
    %16 = vector.load %arg3[%c0_12, %c512_13] : memref<1x1536xf32, #tpu.memory_space<vmem>>, vector<1x512xf32>
    %17 = vector.broadcast %16 : vector<1x512xf32> to vector<8x512xf32>
    %18 = arith.addf %15, %17 : vector<8x512xf32>
    %cst_14 = arith.constant 0.000000e+00 : f32
    %19 = vector.broadcast %cst_14 : f32 to vector<8x512xf32>
    %20 = arith.maximumf %18, %19 : vector<8x512xf32>
    %21 = arith.truncf %20 : vector<8x512xf32> to vector<8x512xbf16>
    %c512_15 = arith.constant 512 : index
    %c0_16 = arith.constant 0 : index
    %22 = vector.load %arg4[%c512_15, %c0_16] : memref<1536x128xbf16, #tpu.memory_space<vmem>>, vector<512x128xbf16>
    %cst_17 = arith.constant dense<0.000000e+00> : vector<8x128xf32>
    %23 = tpu.matmul %21, %22, %cst_17 {dimension_numbers = #tpu.dot_dimension_numbers<[1], [0], [0], [1], [0, 0, 1, 1], [], []>} : vector<8x512xbf16>, vector<512x128xbf16>, vector<8x128xf32> -> vector<8x128xf32>
    %24 = arith.addf %13, %23 : vector<8x128xf32>
    %c0_18 = arith.constant 0 : index
    %c1024 = arith.constant 1024 : index
    %25 = vector.load %arg2[%c0_18, %c1024] : memref<256x1536xbf16, #tpu.memory_space<vmem>>, vector<256x512xbf16>
    %cst_19 = arith.constant dense<0.000000e+00> : vector<8x512xf32>
    %26 = tpu.matmul %1, %25, %cst_19 {dimension_numbers = #tpu.dot_dimension_numbers<[1], [0], [0], [1], [0, 0, 1, 1], [], []>} : vector<8x256xbf16>, vector<256x512xbf16>, vector<8x512xf32> -> vector<8x512xf32>
    %c0_20 = arith.constant 0 : index
    %c1024_21 = arith.constant 1024 : index
    %27 = vector.load %arg3[%c0_20, %c1024_21] : memref<1x1536xf32, #tpu.memory_space<vmem>>, vector<1x512xf32>
    %28 = vector.broadcast %27 : vector<1x512xf32> to vector<8x512xf32>
    %29 = arith.addf %26, %28 : vector<8x512xf32>
    %cst_22 = arith.constant 0.000000e+00 : f32
    %30 = vector.broadcast %cst_22 : f32 to vector<8x512xf32>
    %31 = arith.maximumf %29, %30 : vector<8x512xf32>
    %32 = arith.truncf %31 : vector<8x512xf32> to vector<8x512xbf16>
    %c1024_23 = arith.constant 1024 : index
    %c0_24 = arith.constant 0 : index
    %33 = vector.load %arg4[%c1024_23, %c0_24] : memref<1536x128xbf16, #tpu.memory_space<vmem>>, vector<512x128xbf16>
    %cst_25 = arith.constant dense<0.000000e+00> : vector<8x128xf32>
    %34 = tpu.matmul %32, %33, %cst_25 {dimension_numbers = #tpu.dot_dimension_numbers<[1], [0], [0], [1], [0, 0, 1, 1], [], []>} : vector<8x512xbf16>, vector<512x128xbf16>, vector<8x128xf32> -> vector<8x128xf32>
    %35 = arith.addf %24, %34 : vector<8x128xf32>
    %c0_26 = arith.constant 0 : index
    %c0_27 = arith.constant 0 : index
    %36 = vector.load %arg5[%c0_26, %c0_27] : memref<1x128xf32, #tpu.memory_space<vmem>>, vector<1x128xf32>
    %37 = vector.broadcast %36 : vector<1x128xf32> to vector<8x128xf32>
    %38 = arith.addf %35, %37 : vector<8x128xf32>
    %cst_28 = arith.constant 0.000000e+00 : f32
    %39 = vector.broadcast %cst_28 : f32 to vector<8x128xf32>
    %40 = arith.maximumf %38, %39 : vector<8x128xf32>
    %c0_29 = arith.constant 0 : index
    %c0_30 = arith.constant 0 : index
    %41 = vector.load %arg6[%c0_29, %c0_30] : memref<1x128xbf16, #tpu.memory_space<vmem>>, vector<1x128xbf16>
    %42 = arith.extf %41 : vector<1x128xbf16> to vector<1x128xf32>
    %43 = vector.broadcast %42 : vector<1x128xf32> to vector<8x128xf32>
    %44 = arith.mulf %40, %43 : vector<8x128xf32>
    %cst_31 = arith.constant dense<0.000000e+00> : vector<8xf32>
    %45 = vector.multi_reduction <add>, %44, %cst_31 [1] : vector<8x128xf32> to vector<8xf32>
    %46 = vector.shape_cast %45 : vector<8xf32> to vector<8x1xf32>
    %c0_32 = arith.constant 0 : index
    %c0_33 = arith.constant 0 : index
    %47 = vector.load %arg7[%c0_32, %c0_33] : memref<1x1xf32, #tpu.memory_space<vmem>>, vector<1x1xf32>
    %48 = vector.broadcast %47 : vector<1x1xf32> to vector<8x1xf32>
    %49 = arith.addf %46, %48 : vector<8x1xf32>
    %cst_34 = arith.constant 0.000000e+00 : f32
    %50 = vector.broadcast %cst_34 : f32 to vector<8x1xf32>
    %51 = arith.maximumf %49, %50 : vector<8x1xf32>
    %c0_35 = arith.constant 0 : index
    %c0_36 = arith.constant 0 : index
    %52 = vector.load %arg8[%c0_35, %c0_36] : memref<8x1xf32, #tpu.memory_space<vmem>>, vector<8x1xf32>
    tpu.vector_store %arg8[%c0_35, %c0_36], %51 {strides = array<i32>} : memref<8x1xf32, #tpu.memory_space<vmem>>, vector<8x1xf32>,
    return
  }
  func.func @transform_0(%arg0: i32) -> (i32, i32) {
    %c0_i32 = arith.constant 0 : i32
    %c0_i32_0 = arith.constant 0 : i32
    return %arg0, %c0_i32 : i32, i32
  }
  func.func @transform_1(%arg0: i32) -> (i32, i32) {
    %c0_i32 = arith.constant 0 : i32
    %c0_i32_0 = arith.constant 0 : i32
    %c0_i32_1 = arith.constant 0 : i32
    return %c0_i32, %c0_i32_0 : i32, i32
  }
  func.func @transform_2(%arg0: i32) -> (i32, i32) {
    %c0_i32 = arith.constant 0 : i32
    %c0_i32_0 = arith.constant 0 : i32
    %c0_i32_1 = arith.constant 0 : i32
    return %c0_i32, %c0_i32_0 : i32, i32
  }
  func.func @transform_3(%arg0: i32) -> (i32, i32) {
    %c0_i32 = arith.constant 0 : i32
    %c0_i32_0 = arith.constant 0 : i32
    %c0_i32_1 = arith.constant 0 : i32
    return %c0_i32, %c0_i32_0 : i32, i32
  }
  func.func @transform_4(%arg0: i32) -> (i32, i32) {
    %c0_i32 = arith.constant 0 : i32
    %c0_i32_0 = arith.constant 0 : i32
    %c0_i32_1 = arith.constant 0 : i32
    return %c0_i32, %c0_i32_0 : i32, i32
  }
  func.func @transform_5(%arg0: i32) -> (i32, i32) {
    %c0_i32 = arith.constant 0 : i32
    %c0_i32_0 = arith.constant 0 : i32
    %c0_i32_1 = arith.constant 0 : i32
    return %c0_i32, %c0_i32_0 : i32, i32
  }
  func.func @transform_6(%arg0: i32) -> (i32, i32) {
    %c0_i32 = arith.constant 0 : i32
    %c0_i32_0 = arith.constant 0 : i32
    %c0_i32_1 = arith.constant 0 : i32
    return %c0_i32, %c0_i32_0 : i32, i32
  }
  func.func @transform_7(%arg0: i32) -> (i32, i32) {
    %c0_i32 = arith.constant 0 : i32
    %c0_i32_0 = arith.constant 0 : i32
    return %arg0, %c0_i32 : i32, i32
  }
}

</mosaic_0001>

<bundles_post_ra>
// kernel: tpu_custom_call.1
= control target key start
LH: loop header
LB: loop body
LE: loop exit
PB: predicated region body
PF: predicated region fallthrough
CT: control target
= control target key end

     0   :  { %s3638_s0 = inlined_call_operand.hbm [shape: f32[8,256], index: 0, kind: input, shape index: {}]   ;;  %s3639_s1 = inlined_call_operand.hbm [shape: bf16[256,1536], index: 1, kind: input, shape index: {}]   ;;  %s3640_s2 = inlined_call_operand.hbm [shape: f32[1,1536], index: 2, kind: input, shape index: {}]   ;;  %s3641_s3 = inlined_call_operand.hbm [shape: bf16[1536,128], index: 3, kind: input, shape index: {}]   ;;  %s3642_s4 = inlined_call_operand.vmem [shape: f32[1,128], index: 4, kind: input, shape index: {}]   ;;  %s3643_s5 = inlined_call_operand.vmem [shape: bf16[1,128], index: 5, kind: input, shape index: {}]   ;;  %s3644_s6 = inlined_call_operand.<no memory space> [shape: f32[1,1], index: 6, kind: input, shape index: {}]   ;;  %s3645_s7 = inlined_call_operand.vmem [shape: f32[8,1], index: 7, kind: output, shape index: {}]  }
   0x1   :  { %v12_v0 = vstv %s3644_s6 }
   0x2   :  { %13 = vst [vmem:[#allocation2] sm:$0x1] %v12_v0 }
   0x3   :  { %14 = vsyncpa [#allocation4], 0 }
   0x4   :  { %15 = vsyncpa [#allocation6], 0 }
   0x5   :  { %16 = vsyncpa [#allocation9], 0  ;;  %s3517_s26 = smov [#allocation5]  }
   0x6   :  { %s32_s27 = sshll.u32 %s3517_s26, 4  ;;  %s33_s27 = int_to_ptr.vmem [resolvable:$true] %s32_s27 }
   0x7   :  { %s3439_s28 = scalar_lea.vmem %s33_s27, 24576  ;;  %p3444_p1 = scmp.lt.s32.totalorder %s33_s27, %s33_s27 }
   0x8   :  { %p3440_p0 = scmp.ne.s32.totalorder %s33_s27, %s3439_s28  ;;  %p3445_p2 = scmp.lt.s32.totalorder %s3439_s28, %s3439_s28 }
   0xa   :  { %p3446_p3 = por %p3445_p2, %p3444_p1 }
   0xc   :  { %p3447_p4 = pnand %p3446_p3, %p3440_p0 }
   0xe   :  { %3450 = shalt.err (!%p3447_p4)
}
   0xf   :  { %s3518_s29 = smov 768   ;;  %s3519_s30 = smov 48  }
  0x10   :  { %38 = dma.hbm_to_vmem [thread:$0]  %s3639_s1, 24576, %s33_s27, [#allocation6], %s3518_s29, %s3518_s29, %s3519_s30  }
  0x11   :  { %s3520_s6 = smov [#allocation3]   ;;  %s3521_s11 = smov [#allocation7]  }
  0x12   :  { %s23_s10 = sshll.u32 %s3520_s6, 4  ;;  %s45_s12 = sshll.u32 %s3521_s11, 4  ;;  %s24_s10 = int_to_ptr.vmem [resolvable:$true] %s23_s10  ;;  %s46_s12 = int_to_ptr.vmem [resolvable:$true] %s45_s12 }
  0x13   :  { %s3459_s13 = scalar_lea.vmem %s24_s10, 256  ;;  %p3464_p6 = scmp.lt.s32.totalorder %s24_s10, %s24_s10 }
  0x14   :  { %p3460_p5 = scmp.ne.s32.totalorder %s24_s10, %s3459_s13  ;;  %p3465_p7 = scmp.lt.s32.totalorder %s3459_s13, %s3459_s13 }
  0x16   :  { %p3466_p8 = por %p3465_p7, %p3464_p6 }
  0x18   :  { %p3467_p9 = pnand %p3466_p8, %p3460_p5 }
  0x1a   :  { %3470 = shalt.err (!%p3467_p9)
}
  0x1b   :  { %26 = dma.hbm_to_vmem [thread:$0]  %s3638_s0, 256, %s24_s10, [#allocation4]  }
  0x1c   :  { %s3479_s16 = scalar_lea.vmem %s46_s12, 192  ;;  %p3484_p11 = scmp.lt.s32.totalorder %s46_s12, %s46_s12 }
  0x1d   :  { %p3480_p10 = scmp.ne.s32.totalorder %s46_s12, %s3479_s16  ;;  %p3485_p12 = scmp.lt.s32.totalorder %s3479_s16, %s3479_s16 }
  0x1f   :  { %p3486_p13 = por %p3485_p12, %p3484_p11 }
  0x21   :  { %p3487_p0 = pnand %p3486_p13, %p3480_p10 }
  0x23   :  { %3490 = shalt.err (!%p3487_p0)
}
  0x24   :  { %48 = dma.hbm_to_vmem [thread:$0]  %s3640_s2, 192, %s46_s12, [#allocation6]  }
  0x25   :  { %s3522_s18 = smov [#allocation8]  }
  0x26   :  { %s54_s19 = sshll.u32 %s3522_s18, 4  ;;  %s55_s19 = int_to_ptr.vmem [resolvable:$true] %s54_s19 }
  0x27   :  { %s3499_s20 = scalar_lea.vmem %s55_s19, 12288  ;;  %p3504_p2 = scmp.lt.s32.totalorder %s55_s19, %s55_s19 }
  0x28   :  { %p3500_p1 = scmp.ne.s32.totalorder %s55_s19, %s3499_s20  ;;  %p3505_p3 = scmp.lt.s32.totalorder %s3499_s20, %s3499_s20 }
  0x2a   :  { %p3506_p4 = por %p3505_p3, %p3504_p2 }
  0x2c   :  { %p3507_p5 = pnand %p3506_p4, %p3500_p1 }
  0x2e   :  { %3510 = shalt.err (!%p3507_p5)
}
  0x2f   :  { %s3523_s0 = smov 64   ;;  %s3524_s21 = smov 4  }
  0x30   :  { %60 = dma.hbm_to_vmem [thread:$0]  %s3641_s3, 12288, %s55_s19, [#allocation9], %s3523_s0, %s3523_s0, %s3524_s21  }
  0x31   :  { %3511 = dma.done.wait [#allocation4], 256  }
  0x32   :  { %3512 = vsyncadd [#allocation4], 4294967040 }
  0x33   :  { %3513 = dma.done.wait [#allocation6], 24768  }
  0x34   :  { %3514 = vsyncadd [#allocation6], 4294942528 }
  0x35   :  { %3515 = dma.done.wait [#allocation9], 12288  }
  0x36   :  { %3516 = vsyncadd [#allocation9], 4294955008  ;;  %v3047_v1 = vld [vmem:[#allocation5 + $0x2a4] ss:$48 sps:$4 sm:$0xff]   ;;  %v3049_v2 = vld [vmem:[#allocation5 + $0x2ac] ss:$48 sps:$4 sm:$0xff]  }
  0x37   :  { %490 = vmatprep.subr.bf16.mxu0 %v3047_v1  ;;  %v3051_v3 = vld [vmem:[#allocation5 + $0x2a0] ss:$48 sps:$4 sm:$0xff]   ;;  %v3052_v4 = vld [vmem:[#allocation5 + $0x2a8] ss:$48 sps:$4 sm:$0xff]   ;;  %531 = vmatprep.subr.bf16.mxu1 %v3049_v2  ;;  %v3053_v5 = vld [vmem:[#allocation5 + $0x244] ss:$48 sps:$4 sm:$0xff]  }
  0x38   :  { %491 = vmatpush1.bf16.msra.mxu0 %v3051_v3  ;;  %532 = vmatpush1.bf16.msra.mxu1 %v3052_v4  ;;  %v3055_v6 = vld [vmem:[#allocation5 + $0x24c] ss:$48 sps:$4 sm:$0xff]   ;;  %v3057_v7 = vld [vmem:[#allocation5 + $0x240] ss:$48 sps:$4 sm:$0xff]   ;;  %v3058_v8 = vld [vmem:[#allocation5 + $0x248] ss:$48 sps:$4 sm:$0xff]  }
  0x39   :  { %492 = vmatprep.subr.bf16.mxu0 %v3053_v5  ;;  %533 = vmatprep.subr.bf16.mxu1 %v3055_v6  ;;  %v3059_v9 = vld [vmem:[#allocation5 + $0x1e4] ss:$48 sps:$4 sm:$0xff]   ;;  %v3061_v10 = vld [vmem:[#allocation5 + $0x1ec] ss:$48 sps:$4 sm:$0xff]   ;;  %v3063_v11 = vld [vmem:[#allocation5 + $0x1e0] ss:$48 sps:$4 sm:$0xff]  }
  0x3a   :  { %v3064_v12 = vld [vmem:[#allocation5 + $0x1e8] ss:$48 sps:$4 sm:$0xff]   ;;  %v3065_v13 = vld [vmem:[#allocation5 + $0x184] ss:$48 sps:$4 sm:$0xff]   ;;  %v3067_v14 = vld [vmem:[#allocation5 + $0x18c] ss:$48 sps:$4 sm:$0xff]  }
  0x3b   :  { %v3069_v15 = vld [vmem:[#allocation5 + $0x180] ss:$48 sps:$4 sm:$0xff]   ;;  %v3070_v16 = vld [vmem:[#allocation5 + $0x188] ss:$48 sps:$4 sm:$0xff]   ;;  %v3071_v17 = vld [vmem:[#allocation5 + $0x124] ss:$48 sps:$4 sm:$0xff]  }
  0x3c   :  { %493 = vmatpush1.bf16.msra.mxu0 %v3057_v7  ;;  %534 = vmatpush1.bf16.msra.mxu1 %v3058_v8  ;;  %v3073_v18 = vld [vmem:[#allocation5 + $0x12c] ss:$48 sps:$4 sm:$0xff]   ;;  %v3075_v19 = vld [vmem:[#allocation5 + $0x120] ss:$48 sps:$4 sm:$0xff]   ;;  %v3076_v20 = vld [vmem:[#allocation5 + $0x128] ss:$48 sps:$4 sm:$0xff]  }
  0x3d   :  { %494 = vmatprep.subr.bf16.mxu0 %v3059_v9  ;;  %535 = vmatprep.subr.bf16.mxu1 %v3061_v10  ;;  %v3077_v21 = vld [vmem:[#allocation5 + $0xc4] ss:$48 sps:$4 sm:$0xff]   ;;  %v3079_v22 = vld [vmem:[#allocation5 + $0xcc] ss:$48 sps:$4 sm:$0xff]   ;;  %v3081_v23 = vld [vmem:[#allocation5 + $0xc0] ss:$48 sps:$4 sm:$0xff]  }
  0x3e   :  { %v3082_v24 = vld [vmem:[#allocation5 + $0xc8] ss:$48 sps:$4 sm:$0xff]   ;;  %v3083_v25 = vld [vmem:[#allocation5 + $0x64] ss:$48 sps:$4 sm:$0xff]   ;;  %v3085_v26 = vld [vmem:[#allocation5 + $0x6c] ss:$48 sps:$4 sm:$0xff]  }
  0x3f   :  { %v3087_v27 = vld [vmem:[#allocation5 + $0x60] ss:$48 sps:$4 sm:$0xff]   ;;  %v3088_v28 = vld [vmem:[#allocation5 + $0x68] ss:$48 sps:$4 sm:$0xff]   ;;  %v3089_v29 = vld [vmem:[#allocation5 + $0x4] ss:$48 sps:$4 sm:$0xff]  }
  0x40   :  { %495 = vmatpush1.bf16.msra.mxu0 %v3063_v11  ;;  %536 = vmatpush1.bf16.msra.mxu1 %v3064_v12  ;;  %v3091_v30 = vld [vmem:[#allocation5 + $0xc] ss:$48 sps:$4 sm:$0xff]   ;;  %v3093_v31 = vld [vmem:[#allocation5] ss:$48 sps:$4 sm:$0xff]   ;;  %v3094_v32 = vld [vmem:[#allocation5 + $0x8] ss:$48 sps:$4 sm:$0xff]  }
  0x41   :  { %496 = vmatprep.subr.bf16.mxu0 %v3065_v13  ;;  %537 = vmatprep.subr.bf16.mxu1 %v3067_v14  ;;  %v3095_v33 = vld [vmem:[#allocation5 + $0x5a4] ss:$48 sps:$4 sm:$0xff]   ;;  %v3097_v34 = vld [vmem:[#allocation5 + $0x5ac] ss:$48 sps:$4 sm:$0xff]   ;;  %v3099_v35 = vld [vmem:[#allocation5 + $0x5a0] ss:$48 sps:$4 sm:$0xff]  }
  0x42   :  { %v3100_v36 = vld [vmem:[#allocation5 + $0x5a8] ss:$48 sps:$4 sm:$0xff]   ;;  %v3101_v37 = vld [vmem:[#allocation5 + $0x544] ss:$48 sps:$4 sm:$0xff]   ;;  %v3103_v38 = vld [vmem:[#allocation5 + $0x54c] ss:$48 sps:$4 sm:$0xff]  }
  0x43   :  { %v3105_v39 = vld [vmem:[#allocation5 + $0x540] ss:$48 sps:$4 sm:$0xff]   ;;  %v3106_v40 = vld [vmem:[#allocation5 + $0x548] ss:$48 sps:$4 sm:$0xff]   ;;  %v3107_v41 = vld [vmem:[#allocation5 + $0x4e4] ss:$48 sps:$4 sm:$0xff]  }
  0x44   :  { %497 = vmatpush1.bf16.msra.mxu0 %v3069_v15  ;;  %538 = vmatpush1.bf16.msra.mxu1 %v3070_v16  ;;  %v3109_v42 = vld [vmem:[#allocation5 + $0x4ec] ss:$48 sps:$4 sm:$0xff]   ;;  %v3111_v43 = vld [vmem:[#allocation5 + $0x4e0] ss:$48 sps:$4 sm:$0xff]   ;;  %v3112_v44 = vld [vmem:[#allocation5 + $0x4e8] ss:$48 sps:$4 sm:$0xff]  }
  0x45   :  { %498 = vmatprep.subr.bf16.mxu0 %v3071_v17  ;;  %539 = vmatprep.subr.bf16.mxu1 %v3073_v18  ;;  %v3113_v45 = vld [vmem:[#allocation5 + $0x484] ss:$48 sps:$4 sm:$0xff]   ;;  %v3115_v46 = vld [vmem:[#allocation5 + $0x48c] ss:$48 sps:$4 sm:$0xff]   ;;  %v3117_v49 = vld [vmem:[#allocation5 + $0x480] ss:$48 sps:$4 sm:$0xff]  }
  0x46   :  { %v81_v47 = vld [vmem:[#allocation3 + $0x8] sm:$0xff]  ;;  %v3119_v51 = vld [vmem:[#allocation5 + $0x424] ss:$48 sps:$4 sm:$0xff]   ;;  %v3123_v53 = vld [vmem:[#allocation5 + $0x420] ss:$48 sps:$4 sm:$0xff]   ;;  %vm2608_vm0 = vcmask 7168  }
  0x47   :  { %v3580_v48 = vpack.c.bf16 %v81_v47, %v81_v47  ;;  %v3118_v50 = vld [vmem:[#allocation5 + $0x488] ss:$48 sps:$4 sm:$0xff]   ;;  %v3121_v52 = vld [vmem:[#allocation5 + $0x42c] ss:$48 sps:$4 sm:$0xff]   ;;  %v3125_v55 = vld [vmem:[#allocation5 + $0x3c4] ss:$48 sps:$4 sm:$0xff]  }
  0x48   :  { %499 = vmatpush1.bf16.msra.mxu0 %v3075_v19  ;;  %540 = vmatpush1.bf16.msra.mxu1 %v3076_v20  ;;  %v3124_v54 = vld [vmem:[#allocation5 + $0x428] ss:$48 sps:$4 sm:$0xff]   ;;  %v3127_v56 = vld [vmem:[#allocation5 + $0x3cc] ss:$48 sps:$4 sm:$0xff]   ;;  %v3129_v57 = vld [vmem:[#allocation5 + $0x3c0] ss:$48 sps:$4 sm:$0xff]  }
  0x49   :  { %500 = vmatprep.subr.bf16.mxu0 %v3077_v21  ;;  %541 = vmatprep.subr.bf16.mxu1 %v3079_v22  ;;  %v3130_v58 = vld [vmem:[#allocation5 + $0x3c8] ss:$48 sps:$4 sm:$0xff]   ;;  %v3131_v59 = vld [vmem:[#allocation5 + $0x364] ss:$48 sps:$4 sm:$0xff]   ;;  %v3133_v60 = vld [vmem:[#allocation5 + $0x36c] ss:$48 sps:$4 sm:$0xff]  }
  0x4a   :  { %522 = vmatprep.mubr.bf16.mxu0 %v3580_v48  ;;  %563 = vmatprep.mubr.bf16.mxu1 %v3580_v48  ;;  %v3135_v61 = vld [vmem:[#allocation5 + $0x360] ss:$48 sps:$4 sm:$0xff]   ;;  %v3136_v62 = vld [vmem:[#allocation5 + $0x368] ss:$48 sps:$4 sm:$0xff]   ;;  %v3137_v63 = vld [vmem:[#allocation5 + $0x304] ss:$48 sps:$4 sm:$0xff]  }
  0x4b   :  { %v3139_v0 = vld [vmem:[#allocation5 + $0x30c] ss:$48 sps:$4 sm:$0xff]   ;;  %v3141_v1 = vld [vmem:[#allocation5 + $0x300] ss:$48 sps:$4 sm:$0xff]   ;;  %v3142_v2 = vld [vmem:[#allocation5 + $0x308] ss:$48 sps:$4 sm:$0xff]  }
  0x4c   :  { %501 = vmatpush1.bf16.msra.mxu0 %v3081_v23  ;;  %542 = vmatpush1.bf16.msra.mxu1 %v3082_v24  ;;  %v80_v3 = vld [vmem:[#allocation3] sm:$0xff]  ;;  %v3148_v5 = vld [vmem:[#allocation5 + $0x2bc] ss:$48 sps:$4 sm:$0xff]   ;;  %v3146_v8 = vld [vmem:[#allocation5 + $0x2b8] ss:$48 sps:$4 sm:$0xff]  }
  0x4d   :  { %502 = vmatprep.subr.bf16.mxu0 %v3083_v25  ;;  %543 = vmatprep.subr.bf16.mxu1 %v3085_v26  ;;  %v3145_v4 = vld [vmem:[#allocation5 + $0x2b4] ss:$48 sps:$4 sm:$0xff]   ;;  %v3584_v6 = vpack.c.bf16 %v80_v3, %v80_v3  ;;  %v3143_v7 = vld [vmem:[#allocation5 + $0x2b0] ss:$48 sps:$4 sm:$0xff]   ;;  %v3154_v10 = vld [vmem:[#allocation5 + $0x25c] ss:$48 sps:$4 sm:$0xff]  }
  0x4e   :  { %v3151_v9 = vld [vmem:[#allocation5 + $0x254] ss:$48 sps:$4 sm:$0xff]   ;;  %v3149_v11 = vld [vmem:[#allocation5 + $0x250] ss:$48 sps:$4 sm:$0xff]   ;;  %v3152_v12 = vld [vmem:[#allocation5 + $0x258] ss:$48 sps:$4 sm:$0xff]  }
  0x4f   :  { %v3157_v13 = vld [vmem:[#allocation5 + $0x1f4] ss:$48 sps:$4 sm:$0xff]   ;;  %v3160_v14 = vld [vmem:[#allocation5 + $0x1fc] ss:$48 sps:$4 sm:$0xff]   ;;  %v3155_v15 = vld [vmem:[#allocation5 + $0x1f0] ss:$48 sps:$4 sm:$0xff]  }
  0x50   :  { %503 = vmatpush1.bf16.msra.mxu0 %v3087_v27  ;;  %544 = vmatpush1.bf16.msra.mxu1 %v3088_v28  ;;  %v3158_v16 = vld [vmem:[#allocation5 + $0x1f8] ss:$48 sps:$4 sm:$0xff]   ;;  %v3163_v17 = vld [vmem:[#allocation5 + $0x194] ss:$48 sps:$4 sm:$0xff]   ;;  %v3166_v18 = vld [vmem:[#allocation5 + $0x19c] ss:$48 sps:$4 sm:$0xff]  }
  0x51   :  { %504 = vmatprep.subr.bf16.mxu0 %v3089_v29  ;;  %545 = vmatprep.subr.bf16.mxu1 %v3091_v30  ;;  %v3161_v19 = vld [vmem:[#allocation5 + $0x190] ss:$48 sps:$4 sm:$0xff]   ;;  %v3164_v20 = vld [vmem:[#allocation5 + $0x198] ss:$48 sps:$4 sm:$0xff]   ;;  %v3169_v21 = vld [vmem:[#allocation5 + $0x134] ss:$48 sps:$4 sm:$0xff]  }
  0x52   :  { %v3172_v22 = vld [vmem:[#allocation5 + $0x13c] ss:$48 sps:$4 sm:$0xff]   ;;  %v3167_v23 = vld [vmem:[#allocation5 + $0x130] ss:$48 sps:$4 sm:$0xff]   ;;  %v3170_v24 = vld [vmem:[#allocation5 + $0x138] ss:$48 sps:$4 sm:$0xff]  }
  0x53   :  { %v3175_v25 = vld [vmem:[#allocation5 + $0xd4] ss:$48 sps:$4 sm:$0xff]   ;;  %v3178_v26 = vld [vmem:[#allocation5 + $0xdc] ss:$48 sps:$4 sm:$0xff]   ;;  %v3173_v27 = vld [vmem:[#allocation5 + $0xd0] ss:$48 sps:$4 sm:$0xff]  }
  0x54   :  { %505 = vmatpush1.bf16.msra.mxu0 %v3093_v31  ;;  %546 = vmatpush1.bf16.msra.mxu1 %v3094_v32  ;;  %v3176_v28 = vld [vmem:[#allocation5 + $0xd8] ss:$48 sps:$4 sm:$0xff]   ;;  %v3181_v29 = vld [vmem:[#allocation5 + $0x74] ss:$48 sps:$4 sm:$0xff]   ;;  %v3184_v30 = vld [vmem:[#allocation5 + $0x7c] ss:$48 sps:$4 sm:$0xff]  }
  0x55   :  { %506 = vmatprep.subr.bf16.mxu0 %v3095_v33  ;;  %547 = vmatprep.subr.bf16.mxu1 %v3097_v34  ;;  %v3179_v31 = vld [vmem:[#allocation5 + $0x70] ss:$48 sps:$4 sm:$0xff]   ;;  %v3182_v32 = vld [vmem:[#allocation5 + $0x78] ss:$48 sps:$4 sm:$0xff]   ;;  %v3187_v33 = vld [vmem:[#allocation5 + $0x14] ss:$48 sps:$4 sm:$0xff]  }
  0x56   :  { %v3190_v34 = vld [vmem:[#allocation5 + $0x1c] ss:$48 sps:$4 sm:$0xff]   ;;  %v3203_v47 = vld [vmem:[#allocation5 + $0x4f0] ss:$48 sps:$4 sm:$0xff]  }
  0x57   :  { %v3238_v3 = vld [vmem:[#allocation5 + $0x31c] ss:$48 sps:$4 sm:$0xff]  }
  0x58   :  { %507 = vmatpush2.bf16.msra.mxu0 %v3099_v35  ;;  %548 = vmatpush2.bf16.msra.mxu1 %v3100_v36  ;;  %v3185_v35 = vld [vmem:[#allocation5 + $0x10] ss:$48 sps:$4 sm:$0xff]   ;;  %v3188_v36 = vld [vmem:[#allocation5 + $0x18] ss:$48 sps:$4 sm:$0xff]  }
  0x59   :  { %508 = vmatprep.subr.bf16.mxu0 %v3101_v37  ;;  %549 = vmatprep.subr.bf16.mxu1 %v3103_v38  ;;  %v3193_v37 = vld [vmem:[#allocation5 + $0x5b4] ss:$48 sps:$4 sm:$0xff]   ;;  %v3196_v38 = vld [vmem:[#allocation5 + $0x5bc] ss:$48 sps:$4 sm:$0xff]  }
  0x5c   :  { %509 = vmatpush2.bf16.msra.mxu0 %v3105_v39  ;;  %550 = vmatpush2.bf16.msra.mxu1 %v3106_v40  ;;  %v3191_v39 = vld [vmem:[#allocation5 + $0x5b0] ss:$48 sps:$4 sm:$0xff]   ;;  %v3194_v40 = vld [vmem:[#allocation5 + $0x5b8] ss:$48 sps:$4 sm:$0xff]  }
  0x5d   :  { %510 = vmatprep.subr.bf16.mxu0 %v3107_v41  ;;  %551 = vmatprep.subr.bf16.mxu1 %v3109_v42  ;;  %v3199_v41 = vld [vmem:[#allocation5 + $0x554] ss:$48 sps:$4 sm:$0xff]   ;;  %v3202_v42 = vld [vmem:[#allocation5 + $0x55c] ss:$48 sps:$4 sm:$0xff]  }
  0x60   :  { %511 = vmatpush2.bf16.msra.mxu0 %v3111_v43  ;;  %552 = vmatpush2.bf16.msra.mxu1 %v3112_v44  ;;  %v3197_v43 = vld [vmem:[#allocation5 + $0x550] ss:$48 sps:$4 sm:$0xff]   ;;  %v3200_v44 = vld [vmem:[#allocation5 + $0x558] ss:$48 sps:$4 sm:$0xff]  }
  0x61   :  { %512 = vmatprep.subr.bf16.mxu0 %v3113_v45  ;;  %553 = vmatprep.subr.bf16.mxu1 %v3115_v46  ;;  %v3205_v45 = vld [vmem:[#allocation5 + $0x4f4] ss:$48 sps:$4 sm:$0xff]   ;;  %v3208_v46 = vld [vmem:[#allocation5 + $0x4fc] ss:$48 sps:$4 sm:$0xff]  }
  0x64   :  { %513 = vmatpush2.bf16.msra.mxu0 %v3117_v49  ;;  %554 = vmatpush2.bf16.msra.mxu1 %v3118_v50  ;;  %v3206_v49 = vld [vmem:[#allocation5 + $0x4f8] ss:$48 sps:$4 sm:$0xff]   ;;  %v3211_v50 = vld [vmem:[#allocation5 + $0x494] ss:$48 sps:$4 sm:$0xff]  }
  0x65   :  { %514 = vmatprep.subr.bf16.mxu0 %v3119_v51  ;;  %555 = vmatprep.subr.bf16.mxu1 %v3121_v52  ;;  %v3214_v51 = vld [vmem:[#allocation5 + $0x49c] ss:$48 sps:$4 sm:$0xff]   ;;  %v3209_v52 = vld [vmem:[#allocation5 + $0x490] ss:$48 sps:$4 sm:$0xff]  }
  0x68   :  { %515 = vmatpush2.bf16.msra.mxu0 %v3123_v53  ;;  %556 = vmatpush2.bf16.msra.mxu1 %v3124_v54  ;;  %v3212_v53 = vld [vmem:[#allocation5 + $0x498] ss:$48 sps:$4 sm:$0xff]   ;;  %v3217_v54 = vld [vmem:[#allocation5 + $0x434] ss:$48 sps:$4 sm:$0xff]  }
  0x69   :  { %516 = vmatprep.subr.bf16.mxu0 %v3125_v55  ;;  %557 = vmatprep.subr.bf16.mxu1 %v3127_v56  ;;  %v3220_v55 = vld [vmem:[#allocation5 + $0x43c] ss:$48 sps:$4 sm:$0xff]   ;;  %v3215_v56 = vld [vmem:[#allocation5 + $0x430] ss:$48 sps:$4 sm:$0xff]  }
  0x6c   :  { %517 = vmatpush2.bf16.msra.mxu0 %v3129_v57  ;;  %558 = vmatpush2.bf16.msra.mxu1 %v3130_v58  ;;  %v3218_v57 = vld [vmem:[#allocation5 + $0x438] ss:$48 sps:$4 sm:$0xff]   ;;  %v3223_v58 = vld [vmem:[#allocation5 + $0x3d4] ss:$48 sps:$4 sm:$0xff]  }
  0x6d   :  { %518 = vmatprep.subr.bf16.mxu0 %v3131_v59  ;;  %559 = vmatprep.subr.bf16.mxu1 %v3133_v60  ;;  %v3226_v59 = vld [vmem:[#allocation5 + $0x3dc] ss:$48 sps:$4 sm:$0xff]   ;;  %v3221_v60 = vld [vmem:[#allocation5 + $0x3d0] ss:$48 sps:$4 sm:$0xff]  }
  0x70   :  { %519 = vmatpush2.bf16.msra.mxu0 %v3135_v61  ;;  %560 = vmatpush2.bf16.msra.mxu1 %v3136_v62  ;;  %v3224_v61 = vld [vmem:[#allocation5 + $0x3d8] ss:$48 sps:$4 sm:$0xff]   ;;  %v3229_v62 = vld [vmem:[#allocation5 + $0x374] ss:$48 sps:$4 sm:$0xff]  }
  0x71   :  { %520 = vmatprep.subr.bf16.mxu0 %v3137_v63  ;;  %561 = vmatprep.subr.bf16.mxu1 %v3139_v0  ;;  %v3232_v63 = vld [vmem:[#allocation5 + $0x37c] ss:$48 sps:$4 sm:$0xff]   ;;  %v3227_v0 = vld [vmem:[#allocation5 + $0x370] ss:$48 sps:$4 sm:$0xff]  }
  0x74   :  { %521 = vmatpush2.bf16.msra.mxu0 %v3141_v1  ;;  %562 = vmatpush2.bf16.msra.mxu1 %v3142_v2  ;;  %v3230_v1 = vld [vmem:[#allocation5 + $0x378] ss:$48 sps:$4 sm:$0xff]   ;;  %v3235_v2 = vld [vmem:[#allocation5 + $0x314] ss:$48 sps:$4 sm:$0xff]  }
  0x75   :  { %1050 = vmatprep.subr.bf16.mxu0 %v3145_v4  ;;  %1091 = vmatprep.subr.bf16.mxu1 %v3148_v5  ;;  %v3233_v4 = vld [vmem:[#allocation5 + $0x310] ss:$48 sps:$4 sm:$0xff]   ;;  %v3236_v5 = vld [vmem:[#allocation5 + $0x318] ss:$48 sps:$4 sm:$0xff]  }
  0x77   :  { %523 = vmatmul.mubr.bf16.vlgmr.msra.gmra.mxu0 %v3584_v6  ;;  %564 = vmatmul.mubr.bf16.vlgmr.msra.gmra.mxu1 %v3584_v6 }
  0x78   :  { %1051 = vmatpush1.bf16.msra.mxu0 %v3143_v7  ;;  %1092 = vmatpush1.bf16.msra.mxu1 %v3146_v8  ;;  %v3239_v7 = vld [vmem:[#allocation8 + $0x178] sm:$0xff]  }
  0x79   :  { %1052 = vmatprep.subr.bf16.mxu0 %v3151_v9  ;;  %1093 = vmatprep.subr.bf16.mxu1 %v3154_v10  ;;  %v3240_v8 = vld [vmem:[#allocation8 + $0x1f8] sm:$0xff]  }
  0x7a   :  { %1082 = vmatprep.mubr.bf16.mxu0 %v3580_v48  ;;  %1123 = vmatprep.mubr.bf16.mxu1 %v3580_v48  ;;  %v3241_v9 = vld [vmem:[#allocation8 + $0x138] sm:$0xff]  }
  0x7b   :  { %v3242_v10 = vld [vmem:[#allocation8 + $0x1b8] sm:$0xff]  }
  0x7c   :  { %1053 = vmatpush1.bf16.msra.mxu0 %v3149_v11  ;;  %1094 = vmatpush1.bf16.msra.mxu1 %v3152_v12  ;;  %v3243_v11 = vld [vmem:[#allocation8 + $0x170] sm:$0xff]  }
  0x7d   :  { %1054 = vmatprep.subr.bf16.mxu0 %v3157_v13  ;;  %1095 = vmatprep.subr.bf16.mxu1 %v3160_v14  ;;  %v3244_v12 = vld [vmem:[#allocation8 + $0x1f0] sm:$0xff]  }
  0x7e   :  { %v3245_v13 = vld [vmem:[#allocation8 + $0x130] sm:$0xff]  }
  0x7f   :  { %v3246_v14 = vld [vmem:[#allocation8 + $0x1b0] sm:$0xff]  }
  0x80   :  { %1055 = vmatpush1.bf16.msra.mxu0 %v3155_v15  ;;  %1096 = vmatpush1.bf16.msra.mxu1 %v3158_v16  ;;  %v3247_v15 = vld [vmem:[#allocation8 + $0x168] sm:$0xff]  }
  0x81   :  { %1056 = vmatprep.subr.bf16.mxu0 %v3163_v17  ;;  %1097 = vmatprep.subr.bf16.mxu1 %v3166_v18  ;;  %v3248_v16 = vld [vmem:[#allocation8 + $0x1e8] sm:$0xff]  }
  0x82   :  { %v3249_v17 = vld [vmem:[#allocation8 + $0x128] sm:$0xff]  }
  0x83   :  { %v3250_v18 = vld [vmem:[#allocation8 + $0x1a8] sm:$0xff]  }
  0x84   :  { %1057 = vmatpush1.bf16.msra.mxu0 %v3161_v19  ;;  %1098 = vmatpush1.bf16.msra.mxu1 %v3164_v20  ;;  %v3251_v19 = vld [vmem:[#allocation8 + $0x160] sm:$0xff]  }
  0x85   :  { %1058 = vmatprep.subr.bf16.mxu0 %v3169_v21  ;;  %1099 = vmatprep.subr.bf16.mxu1 %v3172_v22  ;;  %v3252_v20 = vld [vmem:[#allocation8 + $0x1e0] sm:$0xff]  }
  0x86   :  { %v3253_v21 = vld [vmem:[#allocation8 + $0x120] sm:$0xff]  }
  0x87   :  { %v3254_v22 = vld [vmem:[#allocation8 + $0x1a0] sm:$0xff]  }
  0x88   :  { %1059 = vmatpush1.bf16.msra.mxu0 %v3167_v23  ;;  %1100 = vmatpush1.bf16.msra.mxu1 %v3170_v24  ;;  %v3255_v23 = vld [vmem:[#allocation8 + $0x158] sm:$0xff]  }
  0x89   :  { %1060 = vmatprep.subr.bf16.mxu0 %v3175_v25  ;;  %1101 = vmatprep.subr.bf16.mxu1 %v3178_v26  ;;  %v3256_v24 = vld [vmem:[#allocation8 + $0x1d8] sm:$0xff]  }
  0x8a   :  { %v3257_v25 = vld [vmem:[#allocation8 + $0x118] sm:$0xff]  }
  0x8b   :  { %v3258_v26 = vld [vmem:[#allocation8 + $0x198] sm:$0xff]  }
  0x8c   :  { %1061 = vmatpush1.bf16.msra.mxu0 %v3173_v27  ;;  %1102 = vmatpush1.bf16.msra.mxu1 %v3176_v28  ;;  %v3259_v27 = vld [vmem:[#allocation8 + $0x150] sm:$0xff]  }
  0x8d   :  { %1062 = vmatprep.subr.bf16.mxu0 %v3181_v29  ;;  %1103 = vmatprep.subr.bf16.mxu1 %v3184_v30  ;;  %v3260_v28 = vld [vmem:[#allocation8 + $0x1d0] sm:$0xff]  }
  0x8e   :  { %v3261_v29 = vld [vmem:[#allocation8 + $0x110] sm:$0xff]  }
  0x8f   :  { %v3262_v30 = vld [vmem:[#allocation8 + $0x190] sm:$0xff]  }
  0x90   :  { %1063 = vmatpush1.bf16.msra.mxu0 %v3179_v31  ;;  %1104 = vmatpush1.bf16.msra.mxu1 %v3182_v32  ;;  %v3263_v31 = vld [vmem:[#allocation8 + $0x148] sm:$0xff]  }
  0x91   :  { %1064 = vmatprep.subr.bf16.mxu0 %v3187_v33  ;;  %1105 = vmatprep.subr.bf16.mxu1 %v3190_v34  ;;  %v3264_v32 = vld [vmem:[#allocation8 + $0x1c8] sm:$0xff]  }
  0x92   :  { %v3265_v33 = vld [vmem:[#allocation8 + $0x108] sm:$0xff]  }
  0x93   :  { %v3266_v34 = vld [vmem:[#allocation8 + $0x188] sm:$0xff]  }
  0x94   :  { %1065 = vmatpush1.bf16.msra.mxu0 %v3185_v35  ;;  %1106 = vmatpush1.bf16.msra.mxu1 %v3188_v36  ;;  %v3267_v35 = vld [vmem:[#allocation8 + $0x140] sm:$0xff]  }
  0x95   :  { %1066 = vmatprep.subr.bf16.mxu0 %v3193_v37  ;;  %1107 = vmatprep.subr.bf16.mxu1 %v3196_v38  ;;  %v3268_v36 = vld [vmem:[#allocation8 + $0x1c0] sm:$0xff]  }
  0x96   :  { %v3269_v37 = vld [vmem:[#allocation8 + $0x100] sm:$0xff]  }
  0x97   :  { %v3270_v38 = vld [vmem:[#allocation8 + $0x180] sm:$0xff]  }
  0x98   :  { %1067 = vmatpush2.bf16.msra.mxu0 %v3191_v39  ;;  %1108 = vmatpush2.bf16.msra.mxu1 %v3194_v40  ;;  %v3271_v39 = vld [vmem:[#allocation8 + $0x78] sm:$0xff]  }
  0x99   :  { %1068 = vmatprep.subr.bf16.mxu0 %v3199_v41  ;;  %1109 = vmatprep.subr.bf16.mxu1 %v3202_v42  ;;  %v3272_v40 = vld [vmem:[#allocation8 + $0xf8] sm:$0xff]  }
  0x9c   :  { %1069 = vmatpush2.bf16.msra.mxu0 %v3197_v43  ;;  %1110 = vmatpush2.bf16.msra.mxu1 %v3200_v44 }
  0x9d   :  { %1070 = vmatprep.subr.bf16.mxu0 %v3205_v45  ;;  %1111 = vmatprep.subr.bf16.mxu1 %v3208_v46 }
  0xa0   :  { %1071 = vmatpush2.bf16.msra.mxu0 %v3203_v47  ;;  %1112 = vmatpush2.bf16.msra.mxu1 %v3206_v49 }
  0xa1   :  { %1072 = vmatprep.subr.bf16.mxu0 %v3211_v50  ;;  %1113 = vmatprep.subr.bf16.mxu1 %v3214_v51  ;;  %v150_v50 = vlaneseq }
  0xa3   :  { %v151_v51 = vshrl.u32 %v150_v50, 7  ;;  %v3293_v50 = vld [vmem:[#allocation8 + $0x10] sm:$0xff]  }
  0xa4   :  { %1073 = vmatpush2.bf16.msra.mxu0 %v3209_v52  ;;  %1114 = vmatpush2.bf16.msra.mxu1 %v3212_v53 }
  0xa5   :  { %1074 = vmatprep.subr.bf16.mxu0 %v3217_v54  ;;  %1115 = vmatprep.subr.bf16.mxu1 %v3220_v55  ;;  %v3596_v52 = vsub.s32 1, %v151_v51  ;;  %v3598_v53 = vsub.s32 3, %v151_v51  ;;  %v708_v54 = vld [vmem:[#allocation7 + $0x4] sm:$0xf]  ;;  %v3600_v55 = vld [vmem:[#allocation7] sm:$0xf] }
  0xa8   :  { %1075 = vmatpush2.bf16.msra.mxu0 %v3215_v56  ;;  %1116 = vmatpush2.bf16.msra.mxu1 %v3218_v57  ;;  %v3602_v56 = vsub.s32 0, %v151_v51  ;;  %v3604_v57 = vsub.s32 2, %v151_v51  ;;  %v3294_v51 = vld [vmem:[#allocation8 + $0x90] sm:$0xff]  }
  0xa9   :  { %1076 = vmatprep.subr.bf16.mxu0 %v3223_v58  ;;  %1117 = vmatprep.subr.bf16.mxu1 %v3226_v59 }
  0xaa   :  { %v713_v58 = vrot.slane %v708_v54, %v3602_v56  ;;  %v721_v59 = vrot.slane %v708_v54, %v3604_v57 }
  0xac   :  { %1077 = vmatpush2.bf16.msra.mxu0 %v3221_v60  ;;  %1118 = vmatpush2.bf16.msra.mxu1 %v3224_v61  ;;  %v157_v60 = vrot.slane %v3600_v55, %v3596_v52  ;;  %v165_v61 = vrot.slane %v3600_v55, %v3598_v53 }
  0xad   :  { %1078 = vmatprep.subr.bf16.mxu0 %v3229_v62  ;;  %1119 = vmatprep.subr.bf16.mxu1 %v3232_v63  ;;  %v717_v62 = vrot.slane %v708_v54, %v3596_v52  ;;  %v725_v63 = vrot.slane %v708_v54, %v3598_v53  ;;  %v153_v54 = vrot.slane %v3600_v55, %v3602_v56 }
  0xb0   :  { %1079 = vmatpush2.bf16.msra.mxu0 %v3227_v0  ;;  %1120 = vmatpush2.bf16.msra.mxu1 %v3230_v1 }
  0xb1   :  { %1080 = vmatprep.subr.bf16.mxu0 %v3235_v2  ;;  %1121 = vmatprep.subr.bf16.mxu1 %v3238_v3 }
  0xb4   :  { %1081 = vmatpush2.bf16.msra.mxu0 %v3233_v4  ;;  %1122 = vmatpush2.bf16.msra.mxu1 %v3236_v5 }
  0xb5   :  { %2907 = vmatprep.subr.bf16.mxu0 %v3239_v7  ;;  %2929 = vmatprep.subr.bf16.mxu1 %v3240_v8 }
  0xb7   :  { %1083 = vmatmul.mubr.bf16.vlgmr.msra.gmra.mxu0 %v3584_v6  ;;  %1124 = vmatmul.mubr.bf16.vlgmr.msra.gmra.mxu1 %v3584_v6 }
  0xb8   :  { %2908 = vmatpush3.bf16.msra.mxu0 %v3241_v9  ;;  %2930 = vmatpush3.bf16.msra.mxu1 %v3242_v10 }
  0xb9   :  { %2909 = vmatprep.subr.bf16.mxu0 %v3243_v11  ;;  %2931 = vmatprep.subr.bf16.mxu1 %v3244_v12 }
  0xbc   :  { %2910 = vmatpush3.bf16.msra.mxu0 %v3245_v13  ;;  %2932 = vmatpush3.bf16.msra.mxu1 %v3246_v14 }
  0xbd   :  { %2911 = vmatprep.subr.bf16.mxu0 %v3247_v15  ;;  %2933 = vmatprep.subr.bf16.mxu1 %v3248_v16 }
  0xc0   :  { %2912 = vmatpush3.bf16.msra.mxu0 %v3249_v17  ;;  %2934 = vmatpush3.bf16.msra.mxu1 %v3250_v18 }
  0xc1   :  { %2913 = vmatprep.subr.bf16.mxu0 %v3251_v19  ;;  %2935 = vmatprep.subr.bf16.mxu1 %v3252_v20 }
  0xc4   :  { %2914 = vmatpush3.bf16.msra.mxu0 %v3253_v21  ;;  %2936 = vmatpush3.bf16.msra.mxu1 %v3254_v22 }
  0xc5   :  { %2915 = vmatprep.subr.bf16.mxu0 %v3255_v23  ;;  %2937 = vmatprep.subr.bf16.mxu1 %v3256_v24  ;;  %v3273_v23 = vld [vmem:[#allocation8 + $0x38] sm:$0xff]  }
  0xc6   :  { %v3274_v24 = vld [vmem:[#allocation8 + $0xb8] sm:$0xff]  }
  0xc8   :  { %2916 = vmatpush3.bf16.msra.mxu0 %v3257_v25  ;;  %2938 = vmatpush3.bf16.msra.mxu1 %v3258_v26 }
  0xc9   :  { %2917 = vmatprep.subr.bf16.mxu0 %v3259_v27  ;;  %2939 = vmatprep.subr.bf16.mxu1 %v3260_v28  ;;  %v3275_v27 = vld [vmem:[#allocation8 + $0x70] sm:$0xff]  }
  0xca   :  { %v3276_v28 = vld [vmem:[#allocation8 + $0xf0] sm:$0xff]  }
  0xcc   :  { %2918 = vmatpush3.bf16.msra.mxu0 %v3261_v29  ;;  %2940 = vmatpush3.bf16.msra.mxu1 %v3262_v30 }
  0xcd   :  { %2919 = vmatprep.subr.bf16.mxu0 %v3263_v31  ;;  %2941 = vmatprep.subr.bf16.mxu1 %v3264_v32  ;;  %v3277_v31 = vld [vmem:[#allocation8 + $0x30] sm:$0xff]  }
  0xce   :  { %v3278_v32 = vld [vmem:[#allocation8 + $0xb0] sm:$0xff]  }
  0xd0   :  { %2920 = vmatpush3.bf16.msra.mxu0 %v3265_v33  ;;  %2942 = vmatpush3.bf16.msra.mxu1 %v3266_v34  ;;  %v3279_v33 = vld [vmem:[#allocation8 + $0x68] sm:$0xff]  }
  0xd1   :  { %2921 = vmatprep.subr.bf16.mxu0 %v3267_v35  ;;  %2943 = vmatprep.subr.bf16.mxu1 %v3268_v36  ;;  %v3280_v34 = vld [vmem:[#allocation8 + $0xe8] sm:$0xff]  }
  0xd2   :  { %v3281_v35 = vld [vmem:[#allocation8 + $0x28] sm:$0xff]  }
  0xd3   :  { %v3282_v36 = vld [vmem:[#allocation8 + $0xa8] sm:$0xff]  }
  0xd4   :  { %2922 = vmatpush3.bf16.msra.mxu0 %v3269_v37  ;;  %2944 = vmatpush3.bf16.msra.mxu1 %v3270_v38  ;;  %v3283_v37 = vld [vmem:[#allocation8 + $0x60] sm:$0xff]  }
  0xd5   :  { %2951 = vmatprep.subr.bf16.mxu0 %v3271_v39  ;;  %2973 = vmatprep.subr.bf16.mxu1 %v3272_v40  ;;  %v3284_v38 = vld [vmem:[#allocation8 + $0xe0] sm:$0xff]  }
  0xd6   :  { %v3285_v39 = vld [vmem:[#allocation8 + $0x20] sm:$0xff]  }
  0xd7   :  { %v3286_v40 = vld [vmem:[#allocation8 + $0xa0] sm:$0xff]  }
 0x137   :  { %v3592_v41 = vpop.f32.mrf.mxu0  ;;  %v3594_v42 = vpop.f32.mrf.mxu1 }
 0x139   :  { %v526_v43 = vpop.f32.mrf.mxu0  ;;  %v567_v44 = vpop.f32.mrf.mxu1 }
 0x13a   :  { %v527_v4 = vadd.f32 %v526_v43, %v157_v60  ;;  %v568_v5 = vadd.f32 %v567_v44, %v165_v61  ;;  %v3287_v43 = vld [vmem:[#allocation8 + $0x58] sm:$0xff]   ;;  %v3296_v60 = vld [vmem:[#allocation8 + $0xc8] sm:$0xff]  }
 0x13b   :  { %v528_v45 = vpop.f32.mrf.mxu0  ;;  %v569_v46 = vpop.f32.mrf.mxu1  ;;  %v3288_v44 = vld [vmem:[#allocation8 + $0xd8] sm:$0xff]   ;;  %v3297_v61 = vld [vmem:[#allocation8 + $0x8] sm:$0xff]  }
 0x13c   :  { %v573_v17 = vmax.f32 %v527_v4, 0.0  ;;  %v575_v18 = vmax.f32 %v568_v5, 0.0  ;;  %v3289_v45 = vld [vmem:[#allocation8 + $0x18] sm:$0xff]  }
 0x13d   :  { %v529_v47 = vpop.f32.mrf.mxu0  ;;  %v570_v49 = vpop.f32.mrf.mxu1  ;;  %v3290_v46 = vld [vmem:[#allocation8 + $0x98] sm:$0xff]  }
 0x13e   :  { %v577_v29 = vpack.c.bf16 %v573_v17, %v573_v17  ;;  %v579_v30 = vpack.c.bf16 %v575_v18, %v575_v18  ;;  %v3291_v47 = vld [vmem:[#allocation8 + $0x50] sm:$0xff]   ;;  %v3318_v18 = vld [vmem:[#allocation5 + $0x208] ss:$48 sps:$4 sm:$0xff]  }
 0x13f   :  { %v3292_v49 = vld [vmem:[#allocation8 + $0xd0] sm:$0xff]  }
 0x140   :  { %v3315_v17 = vld [vmem:[#allocation5 + $0x200] ss:$48 sps:$4 sm:$0xff]  }
 0x177   :  { %v1084_v0 = vpop.f32.mrf.mxu0  ;;  %v1125_v1 = vpop.f32.mrf.mxu1 }
 0x178   :  { %v1085_v2 = vadd.f32 %v1084_v0, %v713_v58  ;;  %v1126_v3 = vadd.f32 %v1125_v1, %v721_v59  ;;  %v161_v58 = vrot.slane %v3600_v55, %v3604_v57  ;;  %v3295_v59 = vld [vmem:[#allocation8 + $0x48] sm:$0xff]   ;;  %v3299_v1 = vld [vmem:[#allocation8 + $0x40] sm:$0xff]  }
 0x179   :  { %v1086_v7 = vpop.f32.mrf.mxu0  ;;  %v1127_v8 = vpop.f32.mrf.mxu1  ;;  %v3302_v55 = vld [vmem:[#allocation8 + $0x80] sm:$0xff]  }
 0x17a   :  { %v1087_v9 = vadd.f32 %v1086_v7, %v717_v62  ;;  %v1128_v10 = vadd.f32 %v1127_v8, %v725_v63  ;;  %v1132_v11 = vmax.f32 %v1085_v2, 0.0  ;;  %v1134_v12 = vmax.f32 %v1126_v3, 0.0  ;;  %v3298_v62 = vld [vmem:[#allocation8 + $0x88] sm:$0xff]   ;;  %v3300_v2 = vld [vmem:[#allocation8 + $0xc0] sm:$0xff]  }
 0x17b   :  { %v1088_v13 = vpop.f32.mrf.mxu0  ;;  %v1129_v14 = vpop.f32.mrf.mxu1  ;;  %v525_v63 = vadd.f32 %v3592_v41, %v153_v54  ;;  %v566_v0 = vadd.f32 %v3594_v42, %v161_v58  ;;  %v3301_v3 = vld [vmem:[#allocation8] sm:$0xff]   ;;  %v3305_v7 = vld [vmem:[#allocation5 + $0x2c4] ss:$48 sps:$4 sm:$0xff]   ;;  %v3306_v41 = vld [vmem:[#allocation5 + $0x2c8] ss:$48 sps:$4 sm:$0xff]  }
 0x17c   :  { %v1133_v15 = vmax.f32 %v1087_v9, 0.0  ;;  %v1135_v16 = vmax.f32 %v1128_v10, 0.0  ;;  %v1136_v25 = vpack.c.bf16 %v1132_v11, %v1132_v11  ;;  %v1138_v26 = vpack.c.bf16 %v1134_v12, %v1134_v12  ;;  %v3308_v8 = vld [vmem:[#allocation5 + $0x2cc] ss:$48 sps:$4 sm:$0xff]   ;;  %v3303_v9 = vld [vmem:[#allocation5 + $0x2c0] ss:$48 sps:$4 sm:$0xff]  }
 0x17d   :  { %v1089_v19 = vpop.f32.mrf.mxu0  ;;  %v1130_v20 = vpop.f32.mrf.mxu1  ;;  %v572_v4 = vmax.f32 %v525_v63, 0.0  ;;  %v574_v5 = vmax.f32 %v566_v0, 0.0  ;;  %v3311_v11 = vld [vmem:[#allocation5 + $0x264] ss:$48 sps:$4 sm:$0xff]   ;;  %v3314_v12 = vld [vmem:[#allocation5 + $0x26c] ss:$48 sps:$4 sm:$0xff]  }
 0x17e   :  { %v1137_v21 = vpack.c.bf16 %v1133_v15, %v1133_v15  ;;  %v1139_v22 = vpack.c.bf16 %v1135_v16, %v1135_v16  ;;  %v3309_v13 = vld [vmem:[#allocation5 + $0x260] ss:$48 sps:$4 sm:$0xff]   ;;  %v3312_v14 = vld [vmem:[#allocation5 + $0x268] ss:$48 sps:$4 sm:$0xff]   ;;  %v3317_v15 = vld [vmem:[#allocation5 + $0x204] ss:$48 sps:$4 sm:$0xff]  }
 0x17f   :  { %v576_v10 = vpack.c.bf16 %v572_v4, %v572_v4  ;;  %v578_v42 = vpack.c.bf16 %v574_v5, %v574_v5  ;;  %v3320_v16 = vld [vmem:[#allocation5 + $0x20c] ss:$48 sps:$4 sm:$0xff]   ;;  %v3323_v19 = vld [vmem:[#allocation5 + $0x1a4] ss:$48 sps:$4 sm:$0xff]   ;;  %v3366_v54 = vld [vmem:[#allocation5 + $0x508] ss:$48 sps:$4 sm:$0xff]  }
 0x180   :  { %1428 = vmatprep.mubr.bf16.mxu0 %v1137_v21  ;;  %1468 = vmatprep.mubr.bf16.mxu1 %v1139_v22  ;;  %v3326_v20 = vld [vmem:[#allocation5 + $0x1ac] ss:$48 sps:$4 sm:$0xff]   ;;  %v3321_v21 = vld [vmem:[#allocation5 + $0x1a0] ss:$48 sps:$4 sm:$0xff]   ;;  %v3324_v22 = vld [vmem:[#allocation5 + $0x1a8] ss:$48 sps:$4 sm:$0xff]  }
 0x181   :  { %1429 = vmatmul.mubr.bf16.vlgmr.msra.gmra.mxu0 %v1136_v25  ;;  %1469 = vmatmul.mubr.bf16.vlgmr.msra.gmra.mxu1 %v1138_v26  ;;  %v3327_v25 = vld [vmem:[#allocation5 + $0x140] ss:$48 sps:$4 sm:$0xff]   ;;  %v3335_v26 = vld [vmem:[#allocation5 + $0xe4] ss:$48 sps:$4 sm:$0xff]   ;;  %v3380_v63 = vld [vmem:[#allocation5 + $0x44c] ss:$48 sps:$4 sm:$0xff]  }
 0x182   :  { %2952 = vmatpush3.bf16.msra.mxu0 %v3273_v23  ;;  %2974 = vmatpush3.bf16.msra.mxu1 %v3274_v24  ;;  %v3329_v23 = vld [vmem:[#allocation5 + $0x144] ss:$48 sps:$4 sm:$0xff]   ;;  %v3332_v24 = vld [vmem:[#allocation5 + $0x14c] ss:$48 sps:$4 sm:$0xff]   ;;  %v3375_v0 = vld [vmem:[#allocation5 + $0x440] ss:$48 sps:$4 sm:$0xff]  }
 0x183   :  { %1700 = vmatprep.mubr.bf16.mxu0 %v577_v29  ;;  %1740 = vmatprep.mubr.bf16.mxu1 %v579_v30  ;;  %v3336_v29 = vld [vmem:[#allocation5 + $0xe8] ss:$48 sps:$4 sm:$0xff]   ;;  %v3341_v30 = vld [vmem:[#allocation5 + $0x84] ss:$48 sps:$4 sm:$0xff]  }
 0x184   :  { %2953 = vmatprep.subr.bf16.mxu0 %v3275_v27  ;;  %2975 = vmatprep.subr.bf16.mxu1 %v3276_v28  ;;  %v3338_v27 = vld [vmem:[#allocation5 + $0xec] ss:$48 sps:$4 sm:$0xff]   ;;  %v3333_v28 = vld [vmem:[#allocation5 + $0xe0] ss:$48 sps:$4 sm:$0xff]   ;;  %v3371_v58 = vld [vmem:[#allocation5 + $0x4a4] ss:$48 sps:$4 sm:$0xff]  }
 0x185   :  { %v3384_v4 = vld [vmem:[#allocation5 + $0x3e8] ss:$48 sps:$4 sm:$0xff]   ;;  %v3389_v5 = vld [vmem:[#allocation5 + $0x384] ss:$48 sps:$4 sm:$0xff]  }
 0x186   :  { %2954 = vmatpush3.bf16.msra.mxu0 %v3277_v31  ;;  %2976 = vmatpush3.bf16.msra.mxu1 %v3278_v32  ;;  %v3344_v31 = vld [vmem:[#allocation5 + $0x8c] ss:$48 sps:$4 sm:$0xff]   ;;  %v3339_v32 = vld [vmem:[#allocation5 + $0x80] ss:$48 sps:$4 sm:$0xff]  }
 0x187   :  { %2955 = vmatprep.subr.bf16.mxu0 %v3279_v33  ;;  %2977 = vmatprep.subr.bf16.mxu1 %v3280_v34  ;;  %v3342_v33 = vld [vmem:[#allocation5 + $0x88] ss:$48 sps:$4 sm:$0xff]   ;;  %v3347_v34 = vld [vmem:[#allocation5 + $0x24] ss:$48 sps:$4 sm:$0xff]  }
 0x18a   :  { %2956 = vmatpush3.bf16.msra.mxu0 %v3281_v35  ;;  %2978 = vmatpush3.bf16.msra.mxu1 %v3282_v36  ;;  %v3350_v35 = vld [vmem:[#allocation5 + $0x2c] ss:$48 sps:$4 sm:$0xff]   ;;  %v3345_v36 = vld [vmem:[#allocation5 + $0x20] ss:$48 sps:$4 sm:$0xff]  }
 0x18b   :  { %2957 = vmatprep.subr.bf16.mxu0 %v3283_v37  ;;  %2979 = vmatprep.subr.bf16.mxu1 %v3284_v38  ;;  %v3348_v37 = vld [vmem:[#allocation5 + $0x28] ss:$48 sps:$4 sm:$0xff]   ;;  %v3353_v38 = vld [vmem:[#allocation5 + $0x5c4] ss:$48 sps:$4 sm:$0xff]  }
 0x18e   :  { %2958 = vmatpush3.bf16.msra.mxu0 %v3285_v39  ;;  %2980 = vmatpush3.bf16.msra.mxu1 %v3286_v40  ;;  %v3356_v39 = vld [vmem:[#allocation5 + $0x5cc] ss:$48 sps:$4 sm:$0xff]   ;;  %v3351_v40 = vld [vmem:[#allocation5 + $0x5c0] ss:$48 sps:$4 sm:$0xff]  }
 0x18f   :  { %2959 = vmatprep.subr.bf16.mxu0 %v3287_v43  ;;  %2981 = vmatprep.subr.bf16.mxu1 %v3288_v44  ;;  %v3354_v43 = vld [vmem:[#allocation5 + $0x5c8] ss:$48 sps:$4 sm:$0xff]   ;;  %v3359_v44 = vld [vmem:[#allocation5 + $0x564] ss:$48 sps:$4 sm:$0xff]  }
 0x192   :  { %2960 = vmatpush3.bf16.msra.mxu0 %v3289_v45  ;;  %2982 = vmatpush3.bf16.msra.mxu1 %v3290_v46  ;;  %v3362_v45 = vld [vmem:[#allocation5 + $0x56c] ss:$48 sps:$4 sm:$0xff]   ;;  %v3357_v46 = vld [vmem:[#allocation5 + $0x560] ss:$48 sps:$4 sm:$0xff]  }
 0x193   :  { %2961 = vmatprep.subr.bf16.mxu0 %v3291_v47  ;;  %2983 = vmatprep.subr.bf16.mxu1 %v3292_v49  ;;  %v3360_v47 = vld [vmem:[#allocation5 + $0x568] ss:$48 sps:$4 sm:$0xff]   ;;  %v3365_v49 = vld [vmem:[#allocation5 + $0x504] ss:$48 sps:$4 sm:$0xff]  }
 0x196   :  { %2962 = vmatpush3.bf16.msra.mxu0 %v3293_v50  ;;  %2984 = vmatpush3.bf16.msra.mxu1 %v3294_v51  ;;  %v3368_v50 = vld [vmem:[#allocation5 + $0x50c] ss:$48 sps:$4 sm:$0xff]   ;;  %v3363_v51 = vld [vmem:[#allocation5 + $0x500] ss:$48 sps:$4 sm:$0xff]  }
 0x197   :  { %2963 = vmatprep.subr.bf16.mxu0 %v3295_v59  ;;  %2985 = vmatprep.subr.bf16.mxu1 %v3296_v60  ;;  %v3374_v59 = vld [vmem:[#allocation5 + $0x4ac] ss:$48 sps:$4 sm:$0xff]   ;;  %v3369_v60 = vld [vmem:[#allocation5 + $0x4a0] ss:$48 sps:$4 sm:$0xff]  }
 0x19a   :  { %2964 = vmatpush3.bf16.msra.mxu0 %v3297_v61  ;;  %2986 = vmatpush3.bf16.msra.mxu1 %v3298_v62  ;;  %v3372_v61 = vld [vmem:[#allocation5 + $0x4a8] ss:$48 sps:$4 sm:$0xff]   ;;  %v3377_v62 = vld [vmem:[#allocation5 + $0x444] ss:$48 sps:$4 sm:$0xff]  }
 0x19b   :  { %2965 = vmatprep.subr.bf16.mxu0 %v3299_v1  ;;  %2987 = vmatprep.subr.bf16.mxu1 %v3300_v2  ;;  %v3378_v1 = vld [vmem:[#allocation5 + $0x448] ss:$48 sps:$4 sm:$0xff]   ;;  %v3383_v2 = vld [vmem:[#allocation5 + $0x3e4] ss:$48 sps:$4 sm:$0xff]  }
 0x19e   :  { %2966 = vmatpush3.bf16.msra.mxu0 %v3301_v3  ;;  %2988 = vmatpush3.bf16.msra.mxu1 %v3302_v55  ;;  %v3386_v3 = vld [vmem:[#allocation5 + $0x3ec] ss:$48 sps:$4 sm:$0xff]   ;;  %v3381_v55 = vld [vmem:[#allocation5 + $0x3e0] ss:$48 sps:$4 sm:$0xff]  }
 0x19f   :  { %2154 = vmatprep.subr.bf16.mxu0 %v3305_v7  ;;  %2195 = vmatprep.subr.bf16.mxu1 %v3308_v8  ;;  %v3392_v7 = vld [vmem:[#allocation5 + $0x38c] ss:$48 sps:$4 sm:$0xff]   ;;  %v3387_v8 = vld [vmem:[#allocation5 + $0x380] ss:$48 sps:$4 sm:$0xff]  }
 0x1a1   :  { %1701 = vmatmul.mubr.bf16.vlgmr.msra.gmra.mxu0 %v576_v10  ;;  %1741 = vmatmul.mubr.bf16.vlgmr.msra.gmra.mxu1 %v578_v42  ;;  %v3398_v10 = vld [vmem:[#allocation5 + $0x32c] ss:$48 sps:$4 sm:$0xff]   ;;  %v3393_v42 = vld [vmem:[#allocation5 + $0x320] ss:$48 sps:$4 sm:$0xff]  }
 0x1a2   :  { %2155 = vmatpush1.bf16.msra.mxu0 %v3303_v9  ;;  %2196 = vmatpush1.bf16.msra.mxu1 %v3306_v41  ;;  %v3390_v9 = vld [vmem:[#allocation5 + $0x388] ss:$48 sps:$4 sm:$0xff]   ;;  %v3395_v41 = vld [vmem:[#allocation5 + $0x324] ss:$48 sps:$4 sm:$0xff]  }
 0x1a3   :  { %2156 = vmatprep.subr.bf16.mxu0 %v3311_v11  ;;  %2197 = vmatprep.subr.bf16.mxu1 %v3314_v12  ;;  %v3396_v11 = vld [vmem:[#allocation5 + $0x328] ss:$48 sps:$4 sm:$0xff]  }
 0x1a4   :  { %2186 = vmatprep.mubr.bf16.mxu0 %v3580_v48  ;;  %2227 = vmatprep.mubr.bf16.mxu1 %v3580_v48  ;;  %v3330_v48 = vld [vmem:[#allocation5 + $0x148] ss:$48 sps:$4 sm:$0xff]  }
 0x1a5   :  { %v3399_v12 = vld [vmem:[#allocation8 + $0x278] sm:$0xff]  }
 0x1a6   :  { %2157 = vmatpush1.bf16.msra.mxu0 %v3309_v13  ;;  %2198 = vmatpush1.bf16.msra.mxu1 %v3312_v14  ;;  %v3400_v13 = vld [vmem:[#allocation8 + $0x2f8] sm:$0xff]  }
 0x1a7   :  { %2158 = vmatprep.subr.bf16.mxu0 %v3317_v15  ;;  %2199 = vmatprep.subr.bf16.mxu1 %v3320_v16  ;;  %v3401_v14 = vld [vmem:[#allocation8 + $0x238] sm:$0xff]   ;;  %v3403_v16 = vld [vmem:[#allocation8 + $0x270] sm:$0xff]  }
 0x1a8   :  { %v3402_v15 = vld [vmem:[#allocation8 + $0x2b8] sm:$0xff]  }
 0x1aa   :  { %2159 = vmatpush1.bf16.msra.mxu0 %v3315_v17  ;;  %2200 = vmatpush1.bf16.msra.mxu1 %v3318_v18  ;;  %v3404_v17 = vld [vmem:[#allocation8 + $0x2f0] sm:$0xff]  }
 0x1ab   :  { %2160 = vmatprep.subr.bf16.mxu0 %v3323_v19  ;;  %2201 = vmatprep.subr.bf16.mxu1 %v3326_v20  ;;  %v3405_v18 = vld [vmem:[#allocation8 + $0x230] sm:$0xff]   ;;  %v3407_v20 = vld [vmem:[#allocation8 + $0x268] sm:$0xff]  }
 0x1ac   :  { %v3406_v19 = vld [vmem:[#allocation8 + $0x2b0] sm:$0xff]  }
 0x1ae   :  { %2161 = vmatpush1.bf16.msra.mxu0 %v3321_v21  ;;  %2202 = vmatpush1.bf16.msra.mxu1 %v3324_v22  ;;  %v3408_v21 = vld [vmem:[#allocation8 + $0x2e8] sm:$0xff]  }
 0x1af   :  { %2162 = vmatprep.subr.bf16.mxu0 %v3329_v23  ;;  %2203 = vmatprep.subr.bf16.mxu1 %v3332_v24  ;;  %v3409_v22 = vld [vmem:[#allocation8 + $0x228] sm:$0xff]   ;;  %v3411_v23 = vld [vmem:[#allocation8 + $0x260] sm:$0xff]  }
 0x1b0   :  { %v3412_v24 = vld [vmem:[#allocation8 + $0x2e0] sm:$0xff]  }
 0x1b2   :  { %2163 = vmatpush1.bf16.msra.mxu0 %v3327_v25  ;;  %2204 = vmatpush1.bf16.msra.mxu1 %v3330_v48  ;;  %v3413_v25 = vld [vmem:[#allocation8 + $0x220] sm:$0xff]  }
 0x1b3   :  { %2164 = vmatprep.subr.bf16.mxu0 %v3335_v26  ;;  %2205 = vmatprep.subr.bf16.mxu1 %v3338_v27  ;;  %v3414_v48 = vld [vmem:[#allocation8 + $0x2a0] sm:$0xff]   ;;  %v3415_v26 = vld [vmem:[#allocation8 + $0x258] sm:$0xff]  }
 0x1b4   :  { %v3416_v27 = vld [vmem:[#allocation8 + $0x2d8] sm:$0xff]  }
 0x1b6   :  { %2165 = vmatpush1.bf16.msra.mxu0 %v3333_v28  ;;  %2206 = vmatpush1.bf16.msra.mxu1 %v3336_v29  ;;  %v3417_v28 = vld [vmem:[#allocation8 + $0x218] sm:$0xff]  }
 0x1b7   :  { %2166 = vmatprep.subr.bf16.mxu0 %v3341_v30  ;;  %2207 = vmatprep.subr.bf16.mxu1 %v3344_v31  ;;  %v3418_v29 = vld [vmem:[#allocation8 + $0x298] sm:$0xff]   ;;  %v3419_v30 = vld [vmem:[#allocation8 + $0x250] sm:$0xff]  }
 0x1b8   :  { %v3420_v31 = vld [vmem:[#allocation8 + $0x2d0] sm:$0xff]  }
 0x1ba   :  { %2167 = vmatpush1.bf16.msra.mxu0 %v3339_v32  ;;  %2208 = vmatpush1.bf16.msra.mxu1 %v3342_v33  ;;  %v3421_v32 = vld [vmem:[#allocation8 + $0x210] sm:$0xff]  }
 0x1bb   :  { %2168 = vmatprep.subr.bf16.mxu0 %v3347_v34  ;;  %2209 = vmatprep.subr.bf16.mxu1 %v3350_v35  ;;  %v3422_v33 = vld [vmem:[#allocation8 + $0x290] sm:$0xff]   ;;  %v3423_v34 = vld [vmem:[#allocation8 + $0x248] sm:$0xff]  }
 0x1bc   :  { %v3424_v35 = vld [vmem:[#allocation8 + $0x2c8] sm:$0xff]  }
 0x1be   :  { %2169 = vmatpush1.bf16.msra.mxu0 %v3345_v36  ;;  %2210 = vmatpush1.bf16.msra.mxu1 %v3348_v37  ;;  %v3425_v36 = vld [vmem:[#allocation8 + $0x208] sm:$0xff]  }
 0x1bf   :  { %2170 = vmatprep.subr.bf16.mxu0 %v3353_v38  ;;  %2211 = vmatprep.subr.bf16.mxu1 %v3356_v39  ;;  %v3426_v37 = vld [vmem:[#allocation8 + $0x288] sm:$0xff]   ;;  %v3427_v38 = vld [vmem:[#allocation8 + $0x240] sm:$0xff]  }
 0x1c0   :  { %v3428_v39 = vld [vmem:[#allocation8 + $0x2c0] sm:$0xff]  }
 0x1c2   :  { %2171 = vmatpush2.bf16.msra.mxu0 %v3351_v40  ;;  %2212 = vmatpush2.bf16.msra.mxu1 %v3354_v43  ;;  %v3429_v40 = vld [vmem:[#allocation8 + $0x200] sm:$0xff]  }
 0x1c3   :  { %2172 = vmatprep.subr.bf16.mxu0 %v3359_v44  ;;  %2213 = vmatprep.subr.bf16.mxu1 %v3362_v45  ;;  %v3430_v43 = vld [vmem:[#allocation8 + $0x280] sm:$0xff]  }
 0x1c6   :  { %2173 = vmatpush2.bf16.msra.mxu0 %v3357_v46  ;;  %2214 = vmatpush2.bf16.msra.mxu1 %v3360_v47 }
 0x1c7   :  { %2174 = vmatprep.subr.bf16.mxu0 %v3365_v49  ;;  %2215 = vmatprep.subr.bf16.mxu1 %v3368_v50 }
 0x1ca   :  { %2175 = vmatpush2.bf16.msra.mxu0 %v3363_v51  ;;  %2216 = vmatpush2.bf16.msra.mxu1 %v3366_v54 }
 0x1cb   :  { %2176 = vmatprep.subr.bf16.mxu0 %v3371_v58  ;;  %2217 = vmatprep.subr.bf16.mxu1 %v3374_v59 }
 0x1ce   :  { %2177 = vmatpush2.bf16.msra.mxu0 %v3369_v60  ;;  %2218 = vmatpush2.bf16.msra.mxu1 %v3372_v61 }
 0x1cf   :  { %2178 = vmatprep.subr.bf16.mxu0 %v3377_v62  ;;  %2219 = vmatprep.subr.bf16.mxu1 %v3380_v63 }
 0x1d2   :  { %2179 = vmatpush2.bf16.msra.mxu0 %v3375_v0  ;;  %2220 = vmatpush2.bf16.msra.mxu1 %v3378_v1 }
 0x1d3   :  { %2180 = vmatprep.subr.bf16.mxu0 %v3383_v2  ;;  %2221 = vmatprep.subr.bf16.mxu1 %v3386_v3 }
 0x1d6   :  { %2181 = vmatpush2.bf16.msra.mxu0 %v3381_v55  ;;  %2222 = vmatpush2.bf16.msra.mxu1 %v3384_v4 }
 0x1d7   :  { %2182 = vmatprep.subr.bf16.mxu0 %v3389_v5  ;;  %2223 = vmatprep.subr.bf16.mxu1 %v3392_v7 }
 0x1da   :  { %2183 = vmatpush2.bf16.msra.mxu0 %v3387_v8  ;;  %2224 = vmatpush2.bf16.msra.mxu1 %v3390_v9  ;;  %v1812_v9 = vld [vmem:[#allocation7 + $0x8] sm:$0xf] }
 0x1db   :  { %2184 = vmatprep.subr.bf16.mxu0 %v3395_v41  ;;  %2225 = vmatprep.subr.bf16.mxu1 %v3398_v10  ;;  %v1817_v41 = vrot.slane %v1812_v9, %v3602_v56  ;;  %v1825_v10 = vrot.slane %v1812_v9, %v3604_v57 }
 0x1de   :  { %2185 = vmatpush2.bf16.msra.mxu0 %v3393_v42  ;;  %2226 = vmatpush2.bf16.msra.mxu1 %v3396_v11  ;;  %v1821_v42 = vrot.slane %v1812_v9, %v3596_v52  ;;  %v1829_v11 = vrot.slane %v1812_v9, %v3598_v53 }
 0x1df   :  { %2995 = vmatprep.subr.bf16.mxu0 %v3399_v12  ;;  %3017 = vmatprep.subr.bf16.mxu1 %v3400_v13 }
 0x1e1   :  { %2187 = vmatmul.mubr.bf16.vlgmr.msra.gmra.mxu0 %v3584_v6  ;;  %2228 = vmatmul.mubr.bf16.vlgmr.msra.gmra.mxu1 %v3584_v6  ;;  %v3410_v6 = vld [vmem:[#allocation8 + $0x2a8] sm:$0xff]  }
 0x1e2   :  { %2996 = vmatpush3.bf16.msra.mxu0 %v3401_v14  ;;  %3018 = vmatpush3.bf16.msra.mxu1 %v3402_v15 }
 0x1e3   :  { %2997 = vmatprep.subr.bf16.mxu0 %v3403_v16  ;;  %3019 = vmatprep.subr.bf16.mxu1 %v3404_v17 }
 0x1e6   :  { %2998 = vmatpush3.bf16.msra.mxu0 %v3405_v18  ;;  %3020 = vmatpush3.bf16.msra.mxu1 %v3406_v19 }
 0x1e7   :  { %2999 = vmatprep.subr.bf16.mxu0 %v3407_v20  ;;  %3021 = vmatprep.subr.bf16.mxu1 %v3408_v21 }
 0x1ea   :  { %3000 = vmatpush3.bf16.msra.mxu0 %v3409_v22  ;;  %3022 = vmatpush3.bf16.msra.mxu1 %v3410_v6 }
 0x1eb   :  { %3001 = vmatprep.subr.bf16.mxu0 %v3411_v23  ;;  %3023 = vmatprep.subr.bf16.mxu1 %v3412_v24 }
 0x1ee   :  { %3002 = vmatpush3.bf16.msra.mxu0 %v3413_v25  ;;  %3024 = vmatpush3.bf16.msra.mxu1 %v3414_v48 }
 0x1ef   :  { %3003 = vmatprep.subr.bf16.mxu0 %v3415_v26  ;;  %3025 = vmatprep.subr.bf16.mxu1 %v3416_v27 }
 0x1f2   :  { %3004 = vmatpush3.bf16.msra.mxu0 %v3417_v28  ;;  %3026 = vmatpush3.bf16.msra.mxu1 %v3418_v29 }
 0x1f3   :  { %3005 = vmatprep.subr.bf16.mxu0 %v3419_v30  ;;  %3027 = vmatprep.subr.bf16.mxu1 %v3420_v31  ;;  %v2590_v31 = vld [vmem:[%s3643_s5] sm:$0x1] }
 0x1f6   :  { %3006 = vmatpush3.bf16.msra.mxu0 %v3421_v32  ;;  %3028 = vmatpush3.bf16.msra.mxu1 %v3422_v33 }
 0x1f7   :  { %3007 = vmatprep.subr.bf16.mxu0 %v3423_v34  ;;  %3029 = vmatprep.subr.bf16.mxu1 %v3424_v35 }
 0x1fa   :  { %3008 = vmatpush3.bf16.msra.mxu0 %v3425_v36  ;;  %3030 = vmatpush3.bf16.msra.mxu1 %v3426_v37  ;;  %v2591_v37 = vunpack.c.l.bf16 %v2590_v31 }
 0x1fb   :  { %3009 = vmatprep.subr.bf16.mxu0 %v3427_v38  ;;  %3031 = vmatprep.subr.bf16.mxu1 %v3428_v39 }
 0x1fe   :  { %3010 = vmatpush3.bf16.msra.mxu0 %v3429_v40  ;;  %3032 = vmatpush3.bf16.msra.mxu1 %v3430_v43  ;;  %v2905_v40 = vld [vmem:[%s3642_s4] ss:$0 sm:$0xff] }
 0x241   :  { %v2923_v44 = vpop.f32.mrf.mxu0  ;;  %v2945_v45 = vpop.f32.mrf.mxu1 }
 0x243   :  { %v2924_v46 = vpop.f32.mrf.mxu0  ;;  %v2946_v47 = vpop.f32.mrf.mxu1 }
 0x244   :  { %v2925_v49 = vadd.f32 %v2924_v46, %v2923_v44  ;;  %v2947_v50 = vadd.f32 %v2946_v47, %v2945_v45  ;;  %v2595_v45 = vrot.slane %v2591_v37, %v3602_v56 }
 0x245   :  { %v2926_v51 = vpop.f32.mrf.mxu0  ;;  %v2948_v54 = vpop.f32.mrf.mxu1 }
 0x246   :  { %v1471_v58 = vadd.f32 %v2947_v50, %v2925_v49  ;;  %v2906_v49 = vld [vmem:[#allocation2] ss:$0 sm:$0xff] }
 0x247   :  { %v2927_v59 = vpop.f32.mrf.mxu0  ;;  %v2949_v60 = vpop.f32.mrf.mxu1 }
 0x261   :  { %v2967_v61 = vpop.f32.mrf.mxu0  ;;  %v2989_v62 = vpop.f32.mrf.mxu1 }
 0x263   :  { %v2968_v63 = vpop.f32.mrf.mxu0  ;;  %v2990_v0 = vpop.f32.mrf.mxu1 }
 0x264   :  { %v2969_v1 = vadd.f32 %v2968_v63, %v2967_v61  ;;  %v2991_v2 = vadd.f32 %v2990_v0, %v2989_v62 }
 0x265   :  { %v2970_v3 = vpop.f32.mrf.mxu0  ;;  %v2992_v55 = vpop.f32.mrf.mxu1 }
 0x266   :  { %v1703_v4 = vadd.f32 %v2969_v1, %v1471_v58 }
 0x267   :  { %v2971_v5 = vpop.f32.mrf.mxu0  ;;  %v2993_v7 = vpop.f32.mrf.mxu1 }
 0x268   :  { %v1743_v8 = vadd.f32 %v2991_v2, %v1703_v4 }
 0x2a1   :  { %v2188_v12 = vpop.f32.mrf.mxu0  ;;  %v2229_v13 = vpop.f32.mrf.mxu1 }
 0x2a2   :  { %v2189_v14 = vadd.f32 %v2188_v12, %v1817_v41  ;;  %v2230_v15 = vadd.f32 %v2229_v13, %v1825_v10 }
 0x2a3   :  { %v2190_v16 = vpop.f32.mrf.mxu0  ;;  %v2231_v17 = vpop.f32.mrf.mxu1 }
 0x2a4   :  { %v2191_v18 = vadd.f32 %v2190_v16, %v1821_v42  ;;  %v2232_v19 = vadd.f32 %v2231_v17, %v1829_v11  ;;  %v2236_v20 = vmax.f32 %v2189_v14, 0.0  ;;  %v2238_v21 = vmax.f32 %v2230_v15, 0.0 }
 0x2a5   :  { %v2192_v22 = vpop.f32.mrf.mxu0  ;;  %v2233_v6 = vpop.f32.mrf.mxu1 }
 0x2a6   :  { %v2237_v23 = vmax.f32 %v2191_v18, 0.0  ;;  %v2239_v24 = vmax.f32 %v2232_v19, 0.0  ;;  %v2240_v26 = vpack.c.bf16 %v2236_v20, %v2236_v20  ;;  %v2242_v53 = vpack.c.bf16 %v2238_v21, %v2238_v21 }
 0x2a7   :  { %v2193_v25 = vpop.f32.mrf.mxu0  ;;  %v2234_v57 = vpop.f32.mrf.mxu1 }
 0x2a8   :  { %v2241_v48 = vpack.c.bf16 %v2237_v23, %v2237_v23  ;;  %v2243_v52 = vpack.c.bf16 %v2239_v24, %v2239_v24 }
 0x2aa   :  { %2532 = vmatprep.mubr.bf16.mxu0 %v2241_v48  ;;  %2572 = vmatprep.mubr.bf16.mxu1 %v2243_v52 }
 0x2ab   :  { %2533 = vmatmul.mubr.bf16.vlgmr.msra.gmra.mxu0 %v2240_v26  ;;  %2573 = vmatmul.mubr.bf16.vlgmr.msra.gmra.mxu1 %v2242_v53 }
 0x36b   :  { %v3011_v27 = vpop.f32.mrf.mxu0  ;;  %v3033_v28 = vpop.f32.mrf.mxu1 }
 0x36d   :  { %v3012_v29 = vpop.f32.mrf.mxu0  ;;  %v3034_v30 = vpop.f32.mrf.mxu1 }
 0x36e   :  { %v3013_v32 = vadd.f32 %v3012_v29, %v3011_v27  ;;  %v3035_v33 = vadd.f32 %v3034_v30, %v3033_v28 }
 0x36f   :  { %v3014_v34 = vpop.f32.mrf.mxu0  ;;  %v3036_v35 = vpop.f32.mrf.mxu1 }
 0x370   :  { %v2575_v36 = vadd.f32 %v3035_v33, %v3013_v32 }
 0x371   :  { %v3015_v38 = vpop.f32.mrf.mxu0  ;;  %v3037_v39 = vpop.f32.mrf.mxu1 }
 0x372   :  { %v2580_v43 = vadd.f32 %v2575_v36, %v1743_v8 }
 0x374   :  { %v2588_v44 = vadd.f32 %v2905_v40, %v2580_v43 }
 0x376   :  { %v2589_v46 = vmax.f32 %v2588_v44, 0.0 }
 0x378   :  { %v2596_v47 = vmul.f32 %v2595_v45, %v2589_v46 }
 0x37a   :  { %2597 = vadd.xlane.f32.xlu0 %v2596_v47 }
 0x403   :  { %v2598_v50 = vpop.xlane.xlu0 %2597 }
 0x404   :  { %v2606_v51 = vadd.f32 %v2906_v49, %v2598_v50 }
 0x406   :  { %v2607_v54 = vmax.f32 %v2606_v51, 0.0 }
 0x408   :  { %2609 = vst.msk [vmem:[%s3645_s7] sm:$0xff] %vm2608_vm0, %v2607_v54 }
 0x409   :  { %2614 = vsyncpa [#allocation4], 1 }
 0x40a   :  { %2615 = vsyncpa [#allocation6], 1 }
 0x40b   :  { %2616 = vsyncpa [#allocation9], 1 }

</bundles_post_ra>
